<compile_context>
chip_gen: v5e
topology: v5e:2x2
jax: 0.10.0
libtpu: 0.0.40
codegen_flags: <defaults>
</compile_context>

<pallas_src>
import functools

import jax
import jax.numpy as jnp
from jax.experimental import pallas as pl
from jax.experimental.pallas import tpu as pltpu

# ---- problem sizes ------------------------------------------------------------
NUM_FEATURES = 74          # num_features = x.size(1) in the PyTorch source
HIDDEN = 250
N_HIDDEN_LAYERS = 9        # the nine Linear(250,250) layers after the first one
# Activation after each of the 9 hidden Linear(250,250) layers, in order
# (verified against the Sequential: Tanh, ReLU, Tanh, Tanh, ReLU, Tanh, Tanh, ReLU, Tanh).
HIDDEN_ACTS = ("tanh", "relu", "tanh", "tanh", "relu",
               "tanh", "tanh", "relu", "tanh")

# padded (TPU lane-friendly) sizes
F_PAD = 128                # 74  -> 128
H_PAD = 256                # 250 -> 256
O_PAD = 128                # 1   -> 128
BN_EPS = 1e-5
BATCH_TILE = 1024          # max rows per grid step
MIN_ROWS_PER_CORE = 128    # keep each tile >= 128 rows when splitting for megacore


def _cdiv(a, b):
    return -(-a // b)


def _round_up(n, m):
    return _cdiv(n, m) * m


def _choose_tile(batch):
    """Balanced batch tiling + >=2 grid steps for moderate batches (v7x megacore)."""
    n_tiles = _cdiv(batch, BATCH_TILE)
    if n_tiles == 1 and batch >= 2 * MIN_ROWS_PER_CORE:
        n_tiles = 2                        # let both TensorCores work on v7x
    return _round_up(_cdiv(batch, n_tiles), 8)


def _bf16_epilogue_supported():
    """bf16 VPU/EUP exists on v6e/v7x; v5e (and unknown) keeps the f32 path."""
    try:
        kind = jax.devices()[0].device_kind.lower()
    except Exception:
        return False
    return ("v6" in kind) or ("v7" in kind) or ("7x" in kind)


_EPILOGUE_DTYPE = jnp.bfloat16 if _bf16_epilogue_supported() else jnp.float32


def _mlp_kernel(x_ref, w0_ref, b0_ref, wh_ref, bh_ref, wo_ref, bo_ref, out_ref,
                *, epilogue_dtype):
    """Whole forward pass for one batch tile. BatchNorm is pre-folded into w0/b0.

    Weights arrive as bf16 (halved DMA); every matmul accumulates in f32 on the
    MXU; bias add + tanh/relu run in `epilogue_dtype` (bf16 on v6e/v7x, f32 on v5e).
    """
    # ---- Linear(74, 250) [with BN folded in] + Tanh ----
    acc = jnp.dot(x_ref[...].astype(jnp.bfloat16), w0_ref[...],
                  preferred_element_type=jnp.float32)            # (T, H_PAD) f32
    h = jnp.tanh(acc.astype(epilogue_dtype) + b0_ref[...])       # (T, H_PAD) edt

    # ---- 9 x Linear(250, 250) with Tanh / ReLU pattern (statically unrolled) ----
    for i, act in enumerate(HIDDEN_ACTS):
        acc = jnp.dot(h.astype(jnp.bfloat16), wh_ref[i],
                      preferred_element_type=jnp.float32)
        a = acc.astype(epilogue_dtype) + bh_ref[i]
        h = jnp.tanh(a) if act == "tanh" else jnp.maximum(a, 0.0)

    # ---- Linear(250, 1) (no activation), lane-dense 128-wide f32 output ----
    out_ref[...] = jnp.dot(h.astype(jnp.bfloat16), wo_ref[...],
                           preferred_element_type=jnp.float32) + bo_ref[...]


def _pad2(a, rows, cols):
    return jnp.zeros((rows, cols), jnp.float32).at[:a.shape[0], :a.shape[1]].set(a)


@jax.jit
def neural_network_forward(x, params):
    """x: (B, 74) float32. Returns (B, 1) float32 logits."""
    (gamma, beta, run_mean, run_var, w0, b0, wh, bh, wo, bo) = params
    B = x.shape[0]
    edt = _EPILOGUE_DTYPE

    # ---- fold BatchNorm1d (eval: running stats + affine) into the first Linear ----
    #   y = ((x - mean) * inv_std * gamma + beta) @ w0 + b0
    #     = x @ (scale^T * w0) + (shift @ w0 + b0)
    inv_std = jax.lax.rsqrt(run_var + BN_EPS)            # (1, F_PAD)
    scale = gamma * inv_std                              # (1, F_PAD)
    shift = beta - run_mean * scale                      # (1, F_PAD)
    w0_eff = (w0 * scale.T).astype(jnp.bfloat16)         # (F_PAD, H_PAD) bf16
    b0_eff = (b0 + shift @ w0).astype(edt)               # (1, H_PAD)    edt

    wh_bf = wh.astype(jnp.bfloat16)                      # (9, H_PAD, H_PAD)
    bh_e = bh.astype(edt)                                # (9, 1, H_PAD)
    wo_bf = wo.astype(jnp.bfloat16)                      # (H_PAD, O_PAD)
    # bo stays f32: final add happens on the f32 MXU accumulator.

    # ---- balanced batch tiling; weights stay resident across grid steps ----
    tile = _choose_tile(B)
    n_tiles = _cdiv(B, tile)
    b_pad = n_tiles * tile
    x_pad = jnp.zeros((b_pad, F_PAD), jnp.float32).at[:B, :NUM_FEATURES].set(x)

    kernel = functools.partial(_mlp_kernel, epilogue_dtype=edt)

    out = pl.pallas_call(
        kernel,
        out_shape=jax.ShapeDtypeStruct((b_pad, O_PAD), jnp.float32),
        grid=(n_tiles,),
        in_specs=[
            pl.BlockSpec((tile, F_PAD), lambda i: (i, 0)),                       # x
            pl.BlockSpec((F_PAD, H_PAD), lambda i: (0, 0)),                      # w0 (bf16)
            pl.BlockSpec((1, H_PAD), lambda i: (0, 0)),                          # b0
            pl.BlockSpec((N_HIDDEN_LAYERS, H_PAD, H_PAD), lambda i: (0, 0, 0)),  # wh (bf16)
            pl.BlockSpec((N_HIDDEN_LAYERS, 1, H_PAD), lambda i: (0, 0, 0)),      # bh
            pl.BlockSpec((H_PAD, O_PAD), lambda i: (0, 0)),                      # wo (bf16)
            pl.BlockSpec((1, O_PAD), lambda i: (0, 0)),                          # bo (f32)
        ],
        out_specs=pl.BlockSpec((tile, O_PAD), lambda i: (i, 0)),
        compiler_params=pltpu.CompilerParams(
            dimension_semantics=("parallel",),          # batch tiles split across TCs (v7x)
            vmem_limit_bytes=16 * 1024 * 1024,          # live footprint <= ~7 MiB at tile=1024
        ),
    )(x_pad, w0_eff, b0_eff, wh_bf, bh_e, wo_bf, bo)

    return out[:B, :1]


def init_params(key):
    """Deterministic synthetic parameters, pre-padded to TPU-friendly shapes (f32)."""
    ks = jax.random.split(key, 2 + 2 * (N_HIDDEN_LAYERS + 2))
    ki = iter(range(len(ks)))

    # BatchNorm1d defaults: gamma=1, beta=0, running_mean=0, running_var=1.
    # Padded lanes: gamma=0, var=1 so the BN fold stays finite and padding stays inert.
    gamma = jnp.zeros((1, F_PAD), jnp.float32).at[0, :NUM_FEATURES].set(1.0)
    beta = jnp.zeros((1, F_PAD), jnp.float32)
    run_mean = jnp.zeros((1, F_PAD), jnp.float32)
    run_var = jnp.ones((1, F_PAD), jnp.float32)

    def lin(key_w, key_b, fan_in, fan_out, rows_pad, cols_pad):
        bound = 1.0 / jnp.sqrt(jnp.float32(fan_in))
        w = jax.random.uniform(key_w, (fan_in, fan_out), jnp.float32, -bound, bound)
        b = jax.random.uniform(key_b, (1, fan_out), jnp.float32, -bound, bound)
        return _pad2(w, rows_pad, cols_pad), _pad2(b, 1, cols_pad)

    w0, b0 = lin(ks[next(ki)], ks[next(ki)], NUM_FEATURES, HIDDEN, F_PAD, H_PAD)

    wh_list, bh_list = [], []
    for _ in range(N_HIDDEN_LAYERS):
        w, b = lin(ks[next(ki)], ks[next(ki)], HIDDEN, HIDDEN, H_PAD, H_PAD)
        wh_list.append(w)
        bh_list.append(b)
    wh = jnp.stack(wh_list)                       # (9, H_PAD, H_PAD)
    bh = jnp.stack(bh_list)                       # (9, 1, H_PAD)

    wo, bo = lin(ks[next(ki)], ks[next(ki)], HIDDEN, 1, H_PAD, O_PAD)

    return (gamma, beta, run_mean, run_var, w0, b0, wh, bh, wo, bo)


if __name__ == "__main__":
    key = jax.random.PRNGKey(0)
    k_params, k_x = jax.random.split(key)

    params = init_params(k_params)
    batch = 8
    x = jax.random.normal(k_x, (batch, NUM_FEATURES), jnp.float32)

    logits = neural_network_forward(x, params)
    jax.block_until_ready(logits)
    assert logits.shape == (batch, 1), logits.shape
    assert bool(jnp.all(jnp.isfinite(logits)))
    print("KERNEL_OK")
</pallas_src>

<mosaic_0001>
module attributes {stable_mosaic.version = 11 : i64} {
  func.func @_mlp_kernel(%arg0: i32, %arg1: memref<8x128xf32, #tpu.memory_space<vmem>>, %arg2: memref<128x256xbf16, #tpu.memory_space<vmem>>, %arg3: memref<1x256xf32, #tpu.memory_space<vmem>>, %arg4: memref<9x256x256xbf16, #tpu.memory_space<vmem>>, %arg5: memref<9x1x256xf32, #tpu.memory_space<vmem>>, %arg6: memref<256x128xbf16, #tpu.memory_space<vmem>>, %arg7: memref<1x128xf32, #tpu.memory_space<vmem>>, %arg8: memref<8x128xf32, #tpu.memory_space<vmem>>) attributes {dimension_semantics = [#tpu.dimension_semantics<parallel>], iteration_bounds = array<i64: 1>, scalar_prefetch = 0 : i64, scratch_operands = 0 : i64, tpu.core_type = #tpu.core_type<tc>, window_params = [{transform_indices = @transform_0, window_bounds = array<i64: 8, 128>}, {pipeline_mode = #tpu.pipeline_mode<synchronous>, transform_indices = @transform_1, window_bounds = array<i64: 128, 256>}, {pipeline_mode = #tpu.pipeline_mode<synchronous>, transform_indices = @transform_2, window_bounds = array<i64: 1, 256>}, {pipeline_mode = #tpu.pipeline_mode<synchronous>, transform_indices = @transform_3, window_bounds = array<i64: 9, 256, 256>}, {pipeline_mode = #tpu.pipeline_mode<synchronous>, transform_indices = @transform_4, window_bounds = array<i64: 9, 1, 256>}, {pipeline_mode = #tpu.pipeline_mode<synchronous>, transform_indices = @transform_5, window_bounds = array<i64: 256, 128>}, {pipeline_mode = #tpu.pipeline_mode<synchronous>, transform_indices = @transform_6, window_bounds = array<i64: 1, 128>}, {transform_indices = @transform_7, window_bounds = array<i64: 8, 128>}]} {
    %c0 = arith.constant 0 : index
    %c0_0 = arith.constant 0 : index
    %0 = vector.load %arg1[%c0, %c0_0] : memref<8x128xf32, #tpu.memory_space<vmem>>, vector<8x128xf32>
    %1 = arith.truncf %0 : vector<8x128xf32> to vector<8x128xbf16>
    %c0_1 = arith.constant 0 : index
    %c0_2 = arith.constant 0 : index
    %2 = vector.load %arg2[%c0_1, %c0_2] : memref<128x256xbf16, #tpu.memory_space<vmem>>, vector<128x256xbf16>
    %cst = arith.constant dense<0.000000e+00> : vector<8x256xf32>
    %3 = tpu.matmul %1, %2, %cst {dimension_numbers = #tpu.dot_dimension_numbers<[1], [0], [0], [1], [0, 0, 1, 1], [], []>} : vector<8x128xbf16>, vector<128x256xbf16>, vector<8x256xf32> -> vector<8x256xf32>
    %c0_3 = arith.constant 0 : index
    %c0_4 = arith.constant 0 : index
    %4 = vector.load %arg3[%c0_3, %c0_4] : memref<1x256xf32, #tpu.memory_space<vmem>>, vector<1x256xf32>
    %5 = vector.broadcast %4 : vector<1x256xf32> to vector<8x256xf32>
    %6 = arith.addf %3, %5 : vector<8x256xf32>
    %7 = math.tanh %6 : vector<8x256xf32>
    %8 = arith.truncf %7 : vector<8x256xf32> to vector<8x256xbf16>
    %c0_5 = arith.constant 0 : index
    %c0_6 = arith.constant 0 : index
    %c0_7 = arith.constant 0 : index
    %9 = vector.load %arg4[%c0_5, %c0_6, %c0_7] : memref<9x256x256xbf16, #tpu.memory_space<vmem>>, vector<1x256x256xbf16>
    %10 = vector.shape_cast %9 : vector<1x256x256xbf16> to vector<256x256xbf16>
    %cst_8 = arith.constant dense<0.000000e+00> : vector<8x256xf32>
    %11 = tpu.matmul %8, %10, %cst_8 {dimension_numbers = #tpu.dot_dimension_numbers<[1], [0], [0], [1], [0, 0, 1, 1], [], []>} : vector<8x256xbf16>, vector<256x256xbf16>, vector<8x256xf32> -> vector<8x256xf32>
    %c0_9 = arith.constant 0 : index
    %c0_10 = arith.constant 0 : index
    %c0_11 = arith.constant 0 : index
    %12 = vector.load %arg5[%c0_9, %c0_10, %c0_11] : memref<9x1x256xf32, #tpu.memory_space<vmem>>, vector<1x1x256xf32>
    %13 = vector.shape_cast %12 : vector<1x1x256xf32> to vector<1x256xf32>
    %14 = vector.broadcast %13 : vector<1x256xf32> to vector<8x256xf32>
    %15 = arith.addf %11, %14 : vector<8x256xf32>
    %16 = math.tanh %15 : vector<8x256xf32>
    %17 = arith.truncf %16 : vector<8x256xf32> to vector<8x256xbf16>
    %c1 = arith.constant 1 : index
    %c0_12 = arith.constant 0 : index
    %c0_13 = arith.constant 0 : index
    %18 = vector.load %arg4[%c1, %c0_12, %c0_13] : memref<9x256x256xbf16, #tpu.memory_space<vmem>>, vector<1x256x256xbf16>
    %19 = vector.shape_cast %18 : vector<1x256x256xbf16> to vector<256x256xbf16>
    %cst_14 = arith.constant dense<0.000000e+00> : vector<8x256xf32>
    %20 = tpu.matmul %17, %19, %cst_14 {dimension_numbers = #tpu.dot_dimension_numbers<[1], [0], [0], [1], [0, 0, 1, 1], [], []>} : vector<8x256xbf16>, vector<256x256xbf16>, vector<8x256xf32> -> vector<8x256xf32>
    %c1_15 = arith.constant 1 : index
    %c0_16 = arith.constant 0 : index
    %c0_17 = arith.constant 0 : index
    %21 = vector.load %arg5[%c1_15, %c0_16, %c0_17] : memref<9x1x256xf32, #tpu.memory_space<vmem>>, vector<1x1x256xf32>
    %22 = vector.shape_cast %21 : vector<1x1x256xf32> to vector<1x256xf32>
    %23 = vector.broadcast %22 : vector<1x256xf32> to vector<8x256xf32>
    %24 = arith.addf %20, %23 : vector<8x256xf32>
    %cst_18 = arith.constant 0.000000e+00 : f32
    %25 = vector.broadcast %cst_18 : f32 to vector<8x256xf32>
    %26 = arith.maximumf %24, %25 : vector<8x256xf32>
    %27 = arith.truncf %26 : vector<8x256xf32> to vector<8x256xbf16>
    %c2 = arith.constant 2 : index
    %c0_19 = arith.constant 0 : index
    %c0_20 = arith.constant 0 : index
    %28 = vector.load %arg4[%c2, %c0_19, %c0_20] : memref<9x256x256xbf16, #tpu.memory_space<vmem>>, vector<1x256x256xbf16>
    %29 = vector.shape_cast %28 : vector<1x256x256xbf16> to vector<256x256xbf16>
    %cst_21 = arith.constant dense<0.000000e+00> : vector<8x256xf32>
    %30 = tpu.matmul %27, %29, %cst_21 {dimension_numbers = #tpu.dot_dimension_numbers<[1], [0], [0], [1], [0, 0, 1, 1], [], []>} : vector<8x256xbf16>, vector<256x256xbf16>, vector<8x256xf32> -> vector<8x256xf32>
    %c2_22 = arith.constant 2 : index
    %c0_23 = arith.constant 0 : index
    %c0_24 = arith.constant 0 : index
    %31 = vector.load %arg5[%c2_22, %c0_23, %c0_24] : memref<9x1x256xf32, #tpu.memory_space<vmem>>, vector<1x1x256xf32>
    %32 = vector.shape_cast %31 : vector<1x1x256xf32> to vector<1x256xf32>
    %33 = vector.broadcast %32 : vector<1x256xf32> to vector<8x256xf32>
    %34 = arith.addf %30, %33 : vector<8x256xf32>
    %35 = math.tanh %34 : vector<8x256xf32>
    %36 = arith.truncf %35 : vector<8x256xf32> to vector<8x256xbf16>
    %c3 = arith.constant 3 : index
    %c0_25 = arith.constant 0 : index
    %c0_26 = arith.constant 0 : index
    %37 = vector.load %arg4[%c3, %c0_25, %c0_26] : memref<9x256x256xbf16, #tpu.memory_space<vmem>>, vector<1x256x256xbf16>
    %38 = vector.shape_cast %37 : vector<1x256x256xbf16> to vector<256x256xbf16>
    %cst_27 = arith.constant dense<0.000000e+00> : vector<8x256xf32>
    %39 = tpu.matmul %36, %38, %cst_27 {dimension_numbers = #tpu.dot_dimension_numbers<[1], [0], [0], [1], [0, 0, 1, 1], [], []>} : vector<8x256xbf16>, vector<256x256xbf16>, vector<8x256xf32> -> vector<8x256xf32>
    %c3_28 = arith.constant 3 : index
    %c0_29 = arith.constant 0 : index
    %c0_30 = arith.constant 0 : index
    %40 = vector.load %arg5[%c3_28, %c0_29, %c0_30] : memref<9x1x256xf32, #tpu.memory_space<vmem>>, vector<1x1x256xf32>
    %41 = vector.shape_cast %40 : vector<1x1x256xf32> to vector<1x256xf32>
    %42 = vector.broadcast %41 : vector<1x256xf32> to vector<8x256xf32>
    %43 = arith.addf %39, %42 : vector<8x256xf32>
    %44 = math.tanh %43 : vector<8x256xf32>
    %45 = arith.truncf %44 : vector<8x256xf32> to vector<8x256xbf16>
    %c4 = arith.constant 4 : index
    %c0_31 = arith.constant 0 : index
    %c0_32 = arith.constant 0 : index
    %46 = vector.load %arg4[%c4, %c0_31, %c0_32] : memref<9x256x256xbf16, #tpu.memory_space<vmem>>, vector<1x256x256xbf16>
    %47 = vector.shape_cast %46 : vector<1x256x256xbf16> to vector<256x256xbf16>
    %cst_33 = arith.constant dense<0.000000e+00> : vector<8x256xf32>
    %48 = tpu.matmul %45, %47, %cst_33 {dimension_numbers = #tpu.dot_dimension_numbers<[1], [0], [0], [1], [0, 0, 1, 1], [], []>} : vector<8x256xbf16>, vector<256x256xbf16>, vector<8x256xf32> -> vector<8x256xf32>
    %c4_34 = arith.constant 4 : index
    %c0_35 = arith.constant 0 : index
    %c0_36 = arith.constant 0 : index
    %49 = vector.load %arg5[%c4_34, %c0_35, %c0_36] : memref<9x1x256xf32, #tpu.memory_space<vmem>>, vector<1x1x256xf32>
    %50 = vector.shape_cast %49 : vector<1x1x256xf32> to vector<1x256xf32>
    %51 = vector.broadcast %50 : vector<1x256xf32> to vector<8x256xf32>
    %52 = arith.addf %48, %51 : vector<8x256xf32>
    %cst_37 = arith.constant 0.000000e+00 : f32
    %53 = vector.broadcast %cst_37 : f32 to vector<8x256xf32>
    %54 = arith.maximumf %52, %53 : vector<8x256xf32>
    %55 = arith.truncf %54 : vector<8x256xf32> to vector<8x256xbf16>
    %c5 = arith.constant 5 : index
    %c0_38 = arith.constant 0 : index
    %c0_39 = arith.constant 0 : index
    %56 = vector.load %arg4[%c5, %c0_38, %c0_39] : memref<9x256x256xbf16, #tpu.memory_space<vmem>>, vector<1x256x256xbf16>
    %57 = vector.shape_cast %56 : vector<1x256x256xbf16> to vector<256x256xbf16>
    %cst_40 = arith.constant dense<0.000000e+00> : vector<8x256xf32>
    %58 = tpu.matmul %55, %57, %cst_40 {dimension_numbers = #tpu.dot_dimension_numbers<[1], [0], [0], [1], [0, 0, 1, 1], [], []>} : vector<8x256xbf16>, vector<256x256xbf16>, vector<8x256xf32> -> vector<8x256xf32>
    %c5_41 = arith.constant 5 : index
    %c0_42 = arith.constant 0 : index
    %c0_43 = arith.constant 0 : index
    %59 = vector.load %arg5[%c5_41, %c0_42, %c0_43] : memref<9x1x256xf32, #tpu.memory_space<vmem>>, vector<1x1x256xf32>
    %60 = vector.shape_cast %59 : vector<1x1x256xf32> to vector<1x256xf32>
    %61 = vector.broadcast %60 : vector<1x256xf32> to vector<8x256xf32>
    %62 = arith.addf %58, %61 : vector<8x256xf32>
    %63 = math.tanh %62 : vector<8x256xf32>
    %64 = arith.truncf %63 : vector<8x256xf32> to vector<8x256xbf16>
    %c6 = arith.constant 6 : index
    %c0_44 = arith.constant 0 : index
    %c0_45 = arith.constant 0 : index
    %65 = vector.load %arg4[%c6, %c0_44, %c0_45] : memref<9x256x256xbf16, #tpu.memory_space<vmem>>, vector<1x256x256xbf16>
    %66 = vector.shape_cast %65 : vector<1x256x256xbf16> to vector<256x256xbf16>
    %cst_46 = arith.constant dense<0.000000e+00> : vector<8x256xf32>
    %67 = tpu.matmul %64, %66, %cst_46 {dimension_numbers = #tpu.dot_dimension_numbers<[1], [0], [0], [1], [0, 0, 1, 1], [], []>} : vector<8x256xbf16>, vector<256x256xbf16>, vector<8x256xf32> -> vector<8x256xf32>
    %c6_47 = arith.constant 6 : index
    %c0_48 = arith.constant 0 : index
    %c0_49 = arith.constant 0 : index
    %68 = vector.load %arg5[%c6_47, %c0_48, %c0_49] : memref<9x1x256xf32, #tpu.memory_space<vmem>>, vector<1x1x256xf32>
    %69 = vector.shape_cast %68 : vector<1x1x256xf32> to vector<1x256xf32>
    %70 = vector.broadcast %69 : vector<1x256xf32> to vector<8x256xf32>
    %71 = arith.addf %67, %70 : vector<8x256xf32>
    %72 = math.tanh %71 : vector<8x256xf32>
    %73 = arith.truncf %72 : vector<8x256xf32> to vector<8x256xbf16>
    %c7 = arith.constant 7 : index
    %c0_50 = arith.constant 0 : index
    %c0_51 = arith.constant 0 : index
    %74 = vector.load %arg4[%c7, %c0_50, %c0_51] : memref<9x256x256xbf16, #tpu.memory_space<vmem>>, vector<1x256x256xbf16>
    %75 = vector.shape_cast %74 : vector<1x256x256xbf16> to vector<256x256xbf16>
    %cst_52 = arith.constant dense<0.000000e+00> : vector<8x256xf32>
    %76 = tpu.matmul %73, %75, %cst_52 {dimension_numbers = #tpu.dot_dimension_numbers<[1], [0], [0], [1], [0, 0, 1, 1], [], []>} : vector<8x256xbf16>, vector<256x256xbf16>, vector<8x256xf32> -> vector<8x256xf32>
    %c7_53 = arith.constant 7 : index
    %c0_54 = arith.constant 0 : index
    %c0_55 = arith.constant 0 : index
    %77 = vector.load %arg5[%c7_53, %c0_54, %c0_55] : memref<9x1x256xf32, #tpu.memory_space<vmem>>, vector<1x1x256xf32>
    %78 = vector.shape_cast %77 : vector<1x1x256xf32> to vector<1x256xf32>
    %79 = vector.broadcast %78 : vector<1x256xf32> to vector<8x256xf32>
    %80 = arith.addf %76, %79 : vector<8x256xf32>
    %cst_56 = arith.constant 0.000000e+00 : f32
    %81 = vector.broadcast %cst_56 : f32 to vector<8x256xf32>
    %82 = arith.maximumf %80, %81 : vector<8x256xf32>
    %83 = arith.truncf %82 : vector<8x256xf32> to vector<8x256xbf16>
    %c8 = arith.constant 8 : index
    %c0_57 = arith.constant 0 : index
    %c0_58 = arith.constant 0 : index
    %84 = vector.load %arg4[%c8, %c0_57, %c0_58] : memref<9x256x256xbf16, #tpu.memory_space<vmem>>, vector<1x256x256xbf16>
    %85 = vector.shape_cast %84 : vector<1x256x256xbf16> to vector<256x256xbf16>
    %cst_59 = arith.constant dense<0.000000e+00> : vector<8x256xf32>
    %86 = tpu.matmul %83, %85, %cst_59 {dimension_numbers = #tpu.dot_dimension_numbers<[1], [0], [0], [1], [0, 0, 1, 1], [], []>} : vector<8x256xbf16>, vector<256x256xbf16>, vector<8x256xf32> -> vector<8x256xf32>
    %c8_60 = arith.constant 8 : index
    %c0_61 = arith.constant 0 : index
    %c0_62 = arith.constant 0 : index
    %87 = vector.load %arg5[%c8_60, %c0_61, %c0_62] : memref<9x1x256xf32, #tpu.memory_space<vmem>>, vector<1x1x256xf32>
    %88 = vector.shape_cast %87 : vector<1x1x256xf32> to vector<1x256xf32>
    %89 = vector.broadcast %88 : vector<1x256xf32> to vector<8x256xf32>
    %90 = arith.addf %86, %89 : vector<8x256xf32>
    %91 = math.tanh %90 : vector<8x256xf32>
    %92 = arith.truncf %91 : vector<8x256xf32> to vector<8x256xbf16>
    %c0_63 = arith.constant 0 : index
    %c0_64 = arith.constant 0 : index
    %93 = vector.load %arg6[%c0_63, %c0_64] : memref<256x128xbf16, #tpu.memory_space<vmem>>, vector<256x128xbf16>
    %cst_65 = arith.constant dense<0.000000e+00> : vector<8x128xf32>
    %94 = tpu.matmul %92, %93, %cst_65 {dimension_numbers = #tpu.dot_dimension_numbers<[1], [0], [0], [1], [0, 0, 1, 1], [], []>} : vector<8x256xbf16>, vector<256x128xbf16>, vector<8x128xf32> -> vector<8x128xf32>
    %c0_66 = arith.constant 0 : index
    %c0_67 = arith.constant 0 : index
    %95 = vector.load %arg7[%c0_66, %c0_67] : memref<1x128xf32, #tpu.memory_space<vmem>>, vector<1x128xf32>
    %96 = vector.broadcast %95 : vector<1x128xf32> to vector<8x128xf32>
    %97 = arith.addf %94, %96 : vector<8x128xf32>
    %c0_68 = arith.constant 0 : index
    %c0_69 = arith.constant 0 : index
    %98 = vector.load %arg8[%c0_68, %c0_69] : memref<8x128xf32, #tpu.memory_space<vmem>>, vector<8x128xf32>
    tpu.vector_store %arg8[%c0_68, %c0_69], %97 {strides = array<i32>} : memref<8x128xf32, #tpu.memory_space<vmem>>, vector<8x128xf32>,
    return
  }
  func.func @transform_0(%arg0: i32) -> (i32, i32) {
    %c0_i32 = arith.constant 0 : i32
    %c0_i32_0 = arith.constant 0 : i32
    return %arg0, %c0_i32 : i32, i32
  }
  func.func @transform_1(%arg0: i32) -> (i32, i32) {
    %c0_i32 = arith.constant 0 : i32
    %c0_i32_0 = arith.constant 0 : i32
    %c0_i32_1 = arith.constant 0 : i32
    return %c0_i32, %c0_i32_0 : i32, i32
  }
  func.func @transform_2(%arg0: i32) -> (i32, i32) {
    %c0_i32 = arith.constant 0 : i32
    %c0_i32_0 = arith.constant 0 : i32
    %c0_i32_1 = arith.constant 0 : i32
    return %c0_i32, %c0_i32_0 : i32, i32
  }
  func.func @transform_3(%arg0: i32) -> (i32, i32, i32) {
    %c0_i32 = arith.constant 0 : i32
    %c0_i32_0 = arith.constant 0 : i32
    %c0_i32_1 = arith.constant 0 : i32
    %c0_i32_2 = arith.constant 0 : i32
    return %c0_i32, %c0_i32_0, %c0_i32_1 : i32, i32, i32
  }
  func.func @transform_4(%arg0: i32) -> (i32, i32, i32) {
    %c0_i32 = arith.constant 0 : i32
    %c0_i32_0 = arith.constant 0 : i32
    %c0_i32_1 = arith.constant 0 : i32
    %c0_i32_2 = arith.constant 0 : i32
    return %c0_i32, %c0_i32_0, %c0_i32_1 : i32, i32, i32
  }
  func.func @transform_5(%arg0: i32) -> (i32, i32) {
    %c0_i32 = arith.constant 0 : i32
    %c0_i32_0 = arith.constant 0 : i32
    %c0_i32_1 = arith.constant 0 : i32
    return %c0_i32, %c0_i32_0 : i32, i32
  }
  func.func @transform_6(%arg0: i32) -> (i32, i32) {
    %c0_i32 = arith.constant 0 : i32
    %c0_i32_0 = arith.constant 0 : i32
    %c0_i32_1 = arith.constant 0 : i32
    return %c0_i32, %c0_i32_0 : i32, i32
  }
  func.func @transform_7(%arg0: i32) -> (i32, i32) {
    %c0_i32 = arith.constant 0 : i32
    %c0_i32_0 = arith.constant 0 : i32
    return %arg0, %c0_i32 : i32, i32
  }
}

</mosaic_0001>

<bundles_post_ra>
// kernel: neural_network_forward.1
= control target key start
LH: loop header
LB: loop body
LE: loop exit
PB: predicated region body
PF: predicated region fallthrough
CT: control target
= control target key end

     0   :  { %s6469_s1 = inlined_call_operand.vmem [shape: bf16[128,256], index: 1, kind: input, shape index: {}]   ;;  %s6470_s3 = inlined_call_operand.vmem [shape: bf16[9,256,256], index: 3, kind: input, shape index: {}]   ;;  %s6471_s0 = inlined_call_operand.vmem [shape: f32[8,128], index: 0, kind: input, shape index: {}]   ;;  %s6472_s2 = inlined_call_operand.vmem [shape: f32[1,256], index: 2, kind: input, shape index: {}]   ;;  %s6473_s4 = inlined_call_operand.vmem [shape: f32[9,1,256], index: 4, kind: input, shape index: {}]   ;;  %s6474_s5 = inlined_call_operand.vmem [shape: bf16[256,128], index: 5, kind: input, shape index: {}]   ;;  %s6475_s6 = inlined_call_operand.vmem [shape: f32[1,128], index: 6, kind: input, shape index: {}]   ;;  %s6476_s7 = inlined_call_operand.vmem [shape: f32[8,128], index: 7, kind: output, shape index: {}]  }
   0x1   :  { %v2683_v0 = vld [vmem:[%s6469_s1 + $0x70] sm:$0xf]  ;;  %v4184_v1 = vld [vmem:[%s6469_s1 + $0x74] sm:$0xf0]  ;;  %v4183_v2 = vld [vmem:[%s6469_s1 + $0x74] sm:$0xf] }
   0x2   :  { %v2684_v3 = vor.u32 %v4184_v1, %v2683_v0  ;;  %v2685_v4 = vld [vmem:[%s6469_s1 + $0x78] sm:$0xf0]  ;;  %v2675_v5 = vld [vmem:[%s6469_s1 + $0x60] sm:$0xf]  ;;  %v4182_v6 = vld [vmem:[%s6469_s1 + $0x64] sm:$0xf0] }
   0x3   :  { %v2688_v7 = vor.u32 %v4183_v2, %v2685_v4  ;;  %v4181_v8 = vld [vmem:[%s6469_s1 + $0x64] sm:$0xf]  ;;  %v2677_v9 = vld [vmem:[%s6469_s1 + $0x68] sm:$0xf0]  ;;  %v2676_v10 = vor.u32 %v4182_v6, %v2675_v5  ;;  %v2667_v12 = vld [vmem:[%s6469_s1 + $0x50] sm:$0xf] }
   0x4   :  { %130 = vmatpush.bf16.msra.mxu0 %v2684_v3  ;;  %v2680_v11 = vor.u32 %v4181_v8, %v2677_v9  ;;  %v4180_v13 = vld [vmem:[%s6469_s1 + $0x54] sm:$0xf0]  ;;  %v4179_v14 = vld [vmem:[%s6469_s1 + $0x54] sm:$0xf]  ;;  %v2669_v15 = vld [vmem:[%s6469_s1 + $0x58] sm:$0xf0] }
   0x5   :  { %143 = vmatpush.bf16.msra.mxu1 %v2688_v7  ;;  %v2668_v16 = vor.u32 %v4180_v13, %v2667_v12  ;;  %v2672_v17 = vor.u32 %v4179_v14, %v2669_v15  ;;  %v2659_v18 = vld [vmem:[%s6469_s1 + $0x40] sm:$0xf]  ;;  %v4178_v19 = vld [vmem:[%s6469_s1 + $0x44] sm:$0xf0]  ;;  %v4177_v20 = vld [vmem:[%s6469_s1 + $0x44] sm:$0xf] }
   0x6   :  { %v2661_v21 = vld [vmem:[%s6469_s1 + $0x48] sm:$0xf0]  ;;  %v2660_v22 = vor.u32 %v4178_v19, %v2659_v18  ;;  %v2747_v23 = vld [vmem:[%s6470_s3 + $0x70] sm:$0xf]  ;;  %v4200_v24 = vld [vmem:[%s6470_s3 + $0x74] sm:$0xf0] }
   0x7   :  { %v2811_v25 = vld [vmem:[%s6470_s3 + $0xf0] sm:$0xf]  ;;  %v2664_v26 = vor.u32 %v4177_v20, %v2661_v21  ;;  %v4176_v28 = vld [vmem:[%s6469_s1 + $0x34] sm:$0xf0]  ;;  %v2748_v29 = vor.u32 %v4200_v24, %v2747_v23  ;;  %v4175_v31 = vld [vmem:[%s6469_s1 + $0x34] sm:$0xf] }
   0x8   :  { %131 = vmatpush.bf16.msra.mxu0 %v2676_v10  ;;  %v2651_v27 = vld [vmem:[%s6469_s1 + $0x30] sm:$0xf]  ;;  %v4216_v30 = vld [vmem:[%s6470_s3 + $0xf4] sm:$0xf0]  ;;  %v2653_v32 = vld [vmem:[%s6469_s1 + $0x38] sm:$0xf0] }
   0x9   :  { %144 = vmatpush.bf16.msra.mxu1 %v2680_v11  ;;  %v2812_v33 = vor.u32 %v4216_v30, %v2811_v25  ;;  %v2739_v34 = vld [vmem:[%s6470_s3 + $0x60] sm:$0xf]  ;;  %358 = vmatpush.bf16.msra.mxu2 %v2748_v29  ;;  %v4198_v35 = vld [vmem:[%s6470_s3 + $0x64] sm:$0xf0]  ;;  %v2652_v38 = vor.u32 %v4176_v28, %v2651_v27  ;;  %v2656_v43 = vor.u32 %v4175_v31, %v2653_v32  ;;  %v4173_v44 = vld [vmem:[%s6469_s1 + $0x24] sm:$0xf] }
   0xa   :  { %v2803_v36 = vld [vmem:[%s6470_s3 + $0xe0] sm:$0xf]  ;;  %v4214_v37 = vld [vmem:[%s6470_s3 + $0xe4] sm:$0xf0]  ;;  %v2740_v41 = vor.u32 %v4198_v35, %v2739_v34  ;;  %v2731_v45 = vld [vmem:[%s6470_s3 + $0x50] sm:$0xf] }
   0xb   :  { %v2643_v39 = vld [vmem:[%s6469_s1 + $0x20] sm:$0xf]  ;;  %v4174_v40 = vld [vmem:[%s6469_s1 + $0x24] sm:$0xf0]  ;;  %371 = vmatpush.bf16.msra.mxu3 %v2812_v33  ;;  %v2804_v42 = vor.u32 %v4214_v37, %v2803_v36  ;;  %v4196_v46 = vld [vmem:[%s6470_s3 + $0x54] sm:$0xf0] }
   0xc   :  { %132 = vmatpush.bf16.msra.mxu0 %v2668_v16  ;;  %v2645_v47 = vld [vmem:[%s6469_s1 + $0x28] sm:$0xf0]  ;;  %v2795_v48 = vld [vmem:[%s6470_s3 + $0xd0] sm:$0xf]  ;;  %v4212_v49 = vld [vmem:[%s6470_s3 + $0xd4] sm:$0xf0]  ;;  %v2732_v50 = vor.u32 %v4196_v46, %v2731_v45  ;;  %v2644_v51 = vor.u32 %v4174_v40, %v2643_v39 }
   0xd   :  { %145 = vmatpush.bf16.msra.mxu1 %v2672_v17  ;;  %359 = vmatpush.bf16.msra.mxu2 %v2740_v41  ;;  %v2635_v52 = vld [vmem:[%s6469_s1 + $0x10] sm:$0xf]  ;;  %v2796_v53 = vor.u32 %v4212_v49, %v2795_v48  ;;  %v2723_v54 = vld [vmem:[%s6470_s3 + $0x40] sm:$0xf]  ;;  %v4194_v55 = vld [vmem:[%s6470_s3 + $0x44] sm:$0xf0]  ;;  %v2648_v56 = vor.u32 %v4173_v44, %v2645_v47 }
   0xe   :  { %v4172_v57 = vld [vmem:[%s6469_s1 + $0x14] sm:$0xf0]  ;;  %v2787_v58 = vld [vmem:[%s6470_s3 + $0xc0] sm:$0xf]  ;;  %v4210_v59 = vld [vmem:[%s6470_s3 + $0xc4] sm:$0xf0]  ;;  %v2724_v63 = vor.u32 %v4194_v55, %v2723_v54 }
   0xf   :  { %372 = vmatpush.bf16.msra.mxu3 %v2804_v42  ;;  %v4171_v60 = vld [vmem:[%s6469_s1 + $0x14] sm:$0xf]  ;;  %v2637_v61 = vld [vmem:[%s6469_s1 + $0x18] sm:$0xf0]  ;;  %v2627_v62 = vld [vmem:[%s6469_s1] sm:$0xf]  ;;  %v2636_v0 = vor.u32 %v4172_v57, %v2635_v52  ;;  %v2788_v2 = vor.u32 %v4210_v59, %v2787_v58 }
  0x10   :  { %133 = vmatpush.bf16.msra.mxu0 %v2660_v22  ;;  %v4170_v1 = vld [vmem:[%s6469_s1 + $0x4] sm:$0xf0]  ;;  %v2715_v3 = vld [vmem:[%s6470_s3 + $0x30] sm:$0xf]  ;;  %v4192_v4 = vld [vmem:[%s6470_s3 + $0x34] sm:$0xf0]  ;;  %v2640_v5 = vor.u32 %v4171_v60, %v2637_v61 }
  0x11   :  { %146 = vmatpush.bf16.msra.mxu1 %v2664_v26  ;;  %360 = vmatpush.bf16.msra.mxu2 %v2732_v50  ;;  %v4169_v6 = vld [vmem:[%s6469_s1 + $0x4] sm:$0xf]  ;;  %v2779_v7 = vld [vmem:[%s6470_s3 + $0xb0] sm:$0xf]  ;;  %v4208_v8 = vld [vmem:[%s6470_s3 + $0xb4] sm:$0xf0]  ;;  %v2716_v14 = vor.u32 %v4192_v4, %v2715_v3  ;;  %v2628_v15 = vor.u32 %v4170_v1, %v2627_v62 }
  0x12   :  { %v2629_v9 = vld [vmem:[%s6469_s1 + $0x8] sm:$0xf0]  ;;  %v4199_v10 = vld [vmem:[%s6470_s3 + $0x74] sm:$0xf]  ;;  %v2749_v11 = vld [vmem:[%s6470_s3 + $0x78] sm:$0xf0]  ;;  %v2780_v17 = vor.u32 %v4208_v8, %v2779_v7 }
  0x13   :  { %373 = vmatpush.bf16.msra.mxu3 %v2796_v53  ;;  %v4215_v12 = vld [vmem:[%s6470_s3 + $0xf4] sm:$0xf]  ;;  %v2813_v13 = vld [vmem:[%s6470_s3 + $0xf8] sm:$0xf0]  ;;  %v26_v16 = vld [vmem:[%s6471_s0] sm:$0xff]  ;;  %v2632_v18 = vor.u32 %v4169_v6, %v2629_v9  ;;  %v2752_v19 = vor.u32 %v4199_v10, %v2749_v11 }
  0x14   :  { %134 = vmatpush.bf16.msra.mxu0 %v2652_v38  ;;  %v2816_v20 = vor.u32 %v4215_v12, %v2813_v13  ;;  %v4197_v21 = vld [vmem:[%s6470_s3 + $0x64] sm:$0xf]  ;;  %v2741_v22 = vld [vmem:[%s6470_s3 + $0x68] sm:$0xf0]  ;;  %v27_v23 = vpack.c.bf16 %v26_v16, %v26_v16  ;;  %v4195_v28 = vld [vmem:[%s6470_s3 + $0x54] sm:$0xf] }
  0x15   :  { %147 = vmatpush.bf16.msra.mxu1 %v2656_v43  ;;  %361 = vmatpush.bf16.msra.mxu2 %v2724_v63  ;;  %v4213_v24 = vld [vmem:[%s6470_s3 + $0xe4] sm:$0xf]  ;;  %v2805_v25 = vld [vmem:[%s6470_s3 + $0xe8] sm:$0xf0]  ;;  %v2744_v26 = vor.u32 %v4197_v21, %v2741_v22  ;;  %v2733_v29 = vld [vmem:[%s6470_s3 + $0x58] sm:$0xf0] }
  0x16   :  { %v2808_v27 = vor.u32 %v4213_v24, %v2805_v25  ;;  %v4211_v30 = vld [vmem:[%s6470_s3 + $0xd4] sm:$0xf]  ;;  %v2797_v31 = vld [vmem:[%s6470_s3 + $0xd8] sm:$0xf0]  ;;  %v2736_v32 = vor.u32 %v4195_v28, %v2733_v29  ;;  %v4193_v34 = vld [vmem:[%s6470_s3 + $0x44] sm:$0xf] }
  0x17   :  { %374 = vmatpush.bf16.msra.mxu3 %v2788_v2  ;;  %v2800_v33 = vor.u32 %v4211_v30, %v2797_v31  ;;  %v2725_v35 = vld [vmem:[%s6470_s3 + $0x48] sm:$0xf0]  ;;  %v4209_v36 = vld [vmem:[%s6470_s3 + $0xc4] sm:$0xf]  ;;  %v4191_v40 = vld [vmem:[%s6470_s3 + $0x34] sm:$0xf] }
  0x18   :  { %135 = vmatpush.bf16.msra.mxu0 %v2644_v51  ;;  %v2789_v37 = vld [vmem:[%s6470_s3 + $0xc8] sm:$0xf0]  ;;  %v2728_v38 = vor.u32 %v4193_v34, %v2725_v35  ;;  %v2717_v41 = vld [vmem:[%s6470_s3 + $0x38] sm:$0xf0]  ;;  %v4207_v42 = vld [vmem:[%s6470_s3 + $0xb4] sm:$0xf] }
  0x19   :  { %148 = vmatpush.bf16.msra.mxu1 %v2648_v56  ;;  %362 = vmatpush.bf16.msra.mxu2 %v2716_v14  ;;  %v2792_v39 = vor.u32 %v4209_v36, %v2789_v37  ;;  %v2781_v43 = vld [vmem:[%s6470_s3 + $0xb8] sm:$0xf0]  ;;  %v2720_v44 = vor.u32 %v4191_v40, %v2717_v41  ;;  %v2707_v46 = vld [vmem:[%s6470_s3 + $0x20] sm:$0xf]  ;;  %v4190_v47 = vld [vmem:[%s6470_s3 + $0x24] sm:$0xf0] }
  0x1a   :  { %v2784_v45 = vor.u32 %v4207_v42, %v2781_v43  ;;  %v2771_v48 = vld [vmem:[%s6470_s3 + $0xa0] sm:$0xf]  ;;  %v2708_v49 = vor.u32 %v4190_v47, %v2707_v46  ;;  %v4206_v50 = vld [vmem:[%s6470_s3 + $0xa4] sm:$0xf0]  ;;  %v4189_v51 = vld [vmem:[%s6470_s3 + $0x24] sm:$0xf] }
  0x1b   :  { %375 = vmatpush.bf16.msra.mxu3 %v2780_v17  ;;  %v2772_v52 = vor.u32 %v4206_v50, %v2771_v48  ;;  %v2709_v53 = vld [vmem:[%s6470_s3 + $0x28] sm:$0xf0]  ;;  %v4205_v54 = vld [vmem:[%s6470_s3 + $0xa4] sm:$0xf]  ;;  %v2699_v58 = vld [vmem:[%s6470_s3 + $0x10] sm:$0xf] }
  0x1c   :  { %136 = vmatpush.bf16.msra.mxu0 %v2636_v0  ;;  %v2773_v55 = vld [vmem:[%s6470_s3 + $0xa8] sm:$0xf0]  ;;  %v2712_v56 = vor.u32 %v4189_v51, %v2709_v53  ;;  %v4188_v59 = vld [vmem:[%s6470_s3 + $0x14] sm:$0xf0]  ;;  %v2763_v60 = vld [vmem:[%s6470_s3 + $0x90] sm:$0xf] }
  0x1d   :  { %149 = vmatpush.bf16.msra.mxu1 %v2640_v5  ;;  %363 = vmatpush.bf16.msra.mxu2 %v2708_v49  ;;  %v2776_v57 = vor.u32 %v4205_v54, %v2773_v55  ;;  %v2700_v61 = vor.u32 %v4188_v59, %v2699_v58  ;;  %v4204_v62 = vld [vmem:[%s6470_s3 + $0x94] sm:$0xf0]  ;;  %v4187_v63 = vld [vmem:[%s6470_s3 + $0x14] sm:$0xf]  ;;  %v2701_v0 = vld [vmem:[%s6470_s3 + $0x18] sm:$0xf0] }
  0x1e   :  { %v2764_v1 = vor.u32 %v4204_v62, %v2763_v60  ;;  %v2704_v2 = vor.u32 %v4187_v63, %v2701_v0  ;;  %v4203_v3 = vld [vmem:[%s6470_s3 + $0x94] sm:$0xf]  ;;  %v2765_v4 = vld [vmem:[%s6470_s3 + $0x98] sm:$0xf0]  ;;  %v2691_v6 = vld [vmem:[%s6470_s3] sm:$0xf] }
  0x1f   :  { %376 = vmatpush.bf16.msra.mxu3 %v2772_v52  ;;  %v2768_v5 = vor.u32 %v4203_v3, %v2765_v4  ;;  %v4186_v7 = vld [vmem:[%s6470_s3 + $0x4] sm:$0xf0]  ;;  %v2755_v8 = vld [vmem:[%s6470_s3 + $0x80] sm:$0xf]  ;;  %v4185_v11 = vld [vmem:[%s6470_s3 + $0x4] sm:$0xf] }
  0x20   :  { %137 = vmatpush.bf16.msra.mxu0 %v2628_v15  ;;  %v2692_v9 = vor.u32 %v4186_v7, %v2691_v6  ;;  %v4202_v10 = vld [vmem:[%s6470_s3 + $0x84] sm:$0xf0]  ;;  %v2693_v12 = vld [vmem:[%s6470_s3 + $0x8] sm:$0xf0]  ;;  %v4201_v15 = vld [vmem:[%s6470_s3 + $0x84] sm:$0xf] }
  0x21   :  { %150 = vmatpush.bf16.msra.mxu1 %v2632_v18  ;;  %364 = vmatpush.bf16.msra.mxu2 %v2700_v61  ;;  %v2756_v13 = vor.u32 %v4202_v10, %v2755_v8  ;;  %v2696_v14 = vor.u32 %v4185_v11, %v2693_v12  ;;  %v2757_v16 = vld [vmem:[%s6470_s3 + $0x88] sm:$0xf0]  ;;  %v2972_v18 = vld [vmem:[%s6470_s3 + $0x1f0] sm:$0xf]  ;;  %v2974_v22 = vld [vmem:[%s6470_s3 + $0x1f8] sm:$0xf0] }
  0x22   :  { %v2760_v17 = vor.u32 %v4201_v15, %v2757_v16  ;;  %v4246_v24 = vld [vmem:[%s6470_s3 + $0x1e4] sm:$0xf0]  ;;  %v2908_v28 = vld [vmem:[%s6470_s3 + $0x170] sm:$0xf]  ;;  %v4232_v30 = vld [vmem:[%s6470_s3 + $0x174] sm:$0xf0] }
  0x23   :  { %138 = vmatmul.bf16.vlgmr.msra.gmra.mxu0 %v27_v23  ;;  %377 = vmatpush.bf16.msra.mxu3 %v2764_v1  ;;  %v4231_v31 = vld [vmem:[%s6470_s3 + $0x174] sm:$0xf]  ;;  %v2909_v34 = vor.u32 %v4232_v30, %v2908_v28  ;;  %v2956_v36 = vld [vmem:[%s6470_s3 + $0x1d0] sm:$0xf]  ;;  %v4244_v37 = vld [vmem:[%s6470_s3 + $0x1d4] sm:$0xf0] }
  0x24   :  { %384 = vmatpush.bf16.msrb.mxu0 %v2752_v19  ;;  %151 = vmatmul.bf16.vlgmr.msra.gmra.mxu1 %v27_v23  ;;  %v4248_v19 = vld [vmem:[%s6470_s3 + $0x1f4] sm:$0xf0]  ;;  %v2964_v23 = vld [vmem:[%s6470_s3 + $0x1e0] sm:$0xf]  ;;  %v4230_v41 = vld [vmem:[%s6470_s3 + $0x164] sm:$0xf0] }
  0x25   :  { %397 = vmatpush.bf16.msrb.mxu1 %v2816_v20  ;;  %365 = vmatpush.bf16.msra.mxu2 %v2692_v9  ;;  %v4247_v20 = vld [vmem:[%s6470_s3 + $0x1f4] sm:$0xf]  ;;  %v2973_v21 = vor.u32 %v4248_v19, %v2972_v18  ;;  %v2965_v29 = vor.u32 %v4246_v24, %v2964_v23  ;;  %v2900_v40 = vld [vmem:[%s6470_s3 + $0x160] sm:$0xf]  ;;  %v4229_v43 = vld [vmem:[%s6470_s3 + $0x164] sm:$0xf] }
  0x26   :  { %v2977_v25 = vor.u32 %v4247_v20, %v2974_v22  ;;  %v2901_v42 = vor.u32 %v4230_v41, %v2900_v40  ;;  %v2948_v47 = vld [vmem:[%s6470_s3 + $0x1c0] sm:$0xf]  ;;  %v4242_v48 = vld [vmem:[%s6470_s3 + $0x1c4] sm:$0xf0]  ;;  %v2892_v50 = vld [vmem:[%s6470_s3 + $0x150] sm:$0xf] }
  0x27   :  { %378 = vmatpush.bf16.msra.mxu3 %v2756_v13  ;;  %v4228_v51 = vld [vmem:[%s6470_s3 + $0x154] sm:$0xf0]  ;;  %v4227_v52 = vld [vmem:[%s6470_s3 + $0x154] sm:$0xf]  ;;  %v4241_v53 = vld [vmem:[%s6470_s3 + $0x1c4] sm:$0xf]  ;;  %v2949_v58 = vor.u32 %v4242_v48, %v2948_v47 }
  0x28   :  { %385 = vmatpush.bf16.msrb.mxu0 %v2744_v26  ;;  %v4245_v26 = vld [vmem:[%s6470_s3 + $0x1e4] sm:$0xf]  ;;  %v2950_v54 = vld [vmem:[%s6470_s3 + $0x1c8] sm:$0xf0]  ;;  %v2894_v55 = vld [vmem:[%s6470_s3 + $0x158] sm:$0xf0] }
  0x29   :  { %398 = vmatpush.bf16.msrb.mxu1 %v2808_v27  ;;  %v2966_v27 = vld [vmem:[%s6470_s3 + $0x1e8] sm:$0xf0]  ;;  %614 = vmatpush.bf16.msrb.mxu2 %v2909_v34  ;;  %v2953_v59 = vor.u32 %v4241_v53, %v2950_v54  ;;  %v2940_v60 = vld [vmem:[%s6470_s3 + $0x1b0] sm:$0xf]  ;;  %v4240_v61 = vld [vmem:[%s6470_s3 + $0x1b4] sm:$0xf0] }
  0x2a   :  { %v44_v62 = vld [vmem:[%s6472_s2] sm:$0x3]  ;;  %v4239_v63 = vld [vmem:[%s6470_s3 + $0x1b4] sm:$0xf]  ;;  %v2942_v0 = vld [vmem:[%s6470_s3 + $0x1b8] sm:$0xf0]  ;;  %v2941_v1 = vor.u32 %v4240_v61, %v2940_v60 }
  0x2b   :  { %627 = vmatpush.bf16.msrb.mxu3 %v2973_v21  ;;  %v2945_v3 = vor.u32 %v4239_v63, %v2942_v0  ;;  %v47_v4 = vperm.slane %v44_v62, 1  ;;  %v2884_v15 = vld [vmem:[%s6470_s3 + $0x140] sm:$0xf]  ;;  %v4226_v16 = vld [vmem:[%s6470_s3 + $0x144] sm:$0xf0] }
  0x2c   :  { %386 = vmatpush.bf16.msrb.mxu0 %v2736_v32  ;;  %v2910_v32 = vld [vmem:[%s6470_s3 + $0x178] sm:$0xf0]  ;;  %v2885_v18 = vor.u32 %v4226_v16, %v2884_v15  ;;  %v2886_v19 = vld [vmem:[%s6470_s3 + $0x148] sm:$0xf0]  ;;  %v2932_v21 = vld [vmem:[%s6470_s3 + $0x1a0] sm:$0xf] }
  0x2d   :  { %399 = vmatpush.bf16.msrb.mxu1 %v2800_v33  ;;  %v2969_v33 = vor.u32 %v4245_v26, %v2966_v27  ;;  %v2913_v35 = vor.u32 %v4231_v31, %v2910_v32  ;;  %615 = vmatpush.bf16.msrb.mxu2 %v2901_v42  ;;  %v4238_v22 = vld [vmem:[%s6470_s3 + $0x1a4] sm:$0xf0]  ;;  %v4237_v23 = vld [vmem:[%s6470_s3 + $0x1a4] sm:$0xf]  ;;  %v2876_v27 = vld [vmem:[%s6470_s3 + $0x130] sm:$0xf] }
  0x2e   :  { %v2933_v24 = vor.u32 %v4238_v22, %v2932_v21  ;;  %v4224_v28 = vld [vmem:[%s6470_s3 + $0x134] sm:$0xf0]  ;;  %v2878_v31 = vld [vmem:[%s6470_s3 + $0x138] sm:$0xf0]  ;;  %v4222_v40 = vld [vmem:[%s6470_s3 + $0x124] sm:$0xf0] }
  0x2f   :  { %628 = vmatpush.bf16.msrb.mxu3 %v2965_v29  ;;  %v4223_v29 = vld [vmem:[%s6470_s3 + $0x134] sm:$0xf]  ;;  %v2877_v30 = vor.u32 %v4224_v28, %v2876_v27  ;;  %v4236_v34 = vld [vmem:[%s6470_s3 + $0x194] sm:$0xf0]  ;;  %v4221_v41 = vld [vmem:[%s6470_s3 + $0x124] sm:$0xf] }
  0x30   :  { %387 = vmatpush.bf16.msrb.mxu0 %v2728_v38  ;;  %v4243_v38 = vld [vmem:[%s6470_s3 + $0x1d4] sm:$0xf]  ;;  %v2881_v32 = vor.u32 %v4223_v29, %v2878_v31  ;;  %v4233_v47 = vld [vmem:[%s6470_s3 + $0x184] sm:$0xf]  ;;  %v2854_v61 = vld [vmem:[%s6470_s3 + $0x108] sm:$0xf0] }
  0x31   :  { %400 = vmatpush.bf16.msrb.mxu1 %v2792_v39  ;;  %v2958_v39 = vld [vmem:[%s6470_s3 + $0x1d8] sm:$0xf0]  ;;  %v4219_v53 = vld [vmem:[%s6470_s3 + $0x114] sm:$0xf]  ;;  %v3133_v63 = vld [vmem:[%s6470_s3 + $0x2f0] sm:$0xf] }
  0x32   :  { %v2961_v49 = vor.u32 %v4243_v38, %v2958_v39  ;;  %v2868_v39 = vld [vmem:[%s6470_s3 + $0x120] sm:$0xf]  ;;  %v4280_v0 = vld [vmem:[%s6470_s3 + $0x2f4] sm:$0xf0]  ;;  %v3119_v21 = vld [vmem:[%s6470_s3 + $0x2d8] sm:$0xf0] }
  0x33   :  { %v2869_v42 = vor.u32 %v4222_v40, %v2868_v39  ;;  %v3061_v22 = vld [vmem:[%s6470_s3 + $0x260] sm:$0xf]  ;;  %v4274_v31 = vld [vmem:[%s6470_s3 + $0x2c4] sm:$0xf0] }
  0x34   :  { %388 = vmatpush.bf16.msrb.mxu0 %v2720_v44  ;;  %v2902_v44 = vld [vmem:[%s6470_s3 + $0x168] sm:$0xf0] }
  0x35   :  { %401 = vmatpush.bf16.msrb.mxu1 %v2784_v45  ;;  %v2957_v45 = vor.u32 %v4244_v37, %v2956_v36  ;;  %v2905_v46 = vor.u32 %v4229_v43, %v2902_v44  ;;  %v2926_v37 = vld [vmem:[%s6470_s3 + $0x198] sm:$0xf0]  ;;  %v2870_v43 = vld [vmem:[%s6470_s3 + $0x128] sm:$0xf0] }
  0x36   :  { %v2873_v44 = vor.u32 %v4221_v41, %v2870_v43 }
  0x37   :  { %629 = vmatpush.bf16.msrb.mxu3 %v2957_v45  ;;  %v2916_v45 = vld [vmem:[%s6470_s3 + $0x180] sm:$0xf] }
  0x38   :  { %389 = vmatpush.bf16.msrb.mxu0 %v2712_v56  ;;  %v2893_v56 = vor.u32 %v4228_v51, %v2892_v50  ;;  %v2860_v51 = vld [vmem:[%s6470_s3 + $0x110] sm:$0xf] }
  0x39   :  { %402 = vmatpush.bf16.msrb.mxu1 %v2776_v57  ;;  %v2897_v57 = vor.u32 %v4227_v52, %v2894_v55  ;;  %v4220_v52 = vld [vmem:[%s6470_s3 + $0x114] sm:$0xf0]  ;;  %v2862_v55 = vld [vmem:[%s6470_s3 + $0x118] sm:$0xf0] }
  0x3a   :  { %616 = vmatpush.bf16.msrb.mxu2 %v2893_v56  ;;  %v2861_v54 = vor.u32 %v4220_v52, %v2860_v51  ;;  %v2865_v56 = vor.u32 %v4219_v53, %v2862_v55 }
  0x3b   :  { %630 = vmatpush.bf16.msrb.mxu3 %v2949_v58  ;;  %v4218_v58 = vld [vmem:[%s6470_s3 + $0x104] sm:$0xf0] }
  0x3c   :  { %390 = vmatpush.bf16.msrb.mxu0 %v2704_v2  ;;  %v46_v2 = vperm.slane %v44_v62, 0 }
  0x3d   :  { %403 = vmatpush.bf16.msrb.mxu1 %v2768_v5 }
  0x3e   :  { %617 = vmatpush.bf16.msrb.mxu2 %v2885_v18  ;;  %v3117_v18 = vld [vmem:[%s6470_s3 + $0x2d0] sm:$0xf] }
  0x3f   :  { %631 = vmatpush.bf16.msrb.mxu3 %v2941_v1  ;;  %v4279_v1 = vld [vmem:[%s6470_s3 + $0x2f4] sm:$0xf] }
  0x40   :  { %391 = vmatpush.bf16.msrb.mxu0 %v2696_v14 }
  0x41   :  { %404 = vmatpush.bf16.msrb.mxu1 %v2760_v17  ;;  %v4225_v17 = vld [vmem:[%s6470_s3 + $0x144] sm:$0xf] }
  0x42   :  { %v2889_v20 = vor.u32 %v4225_v17, %v2886_v19  ;;  %618 = vmatpush.bf16.msrb.mxu2 %v2877_v30  ;;  %v4276_v19 = vld [vmem:[%s6470_s3 + $0x2d4] sm:$0xf0]  ;;  %v3109_v30 = vld [vmem:[%s6470_s3 + $0x2c0] sm:$0xf] }
  0x43   :  { %632 = vmatpush.bf16.msrb.mxu3 %v2933_v24  ;;  %v3118_v28 = vor.u32 %v4276_v19, %v3117_v18  ;;  %v3110_v41 = vor.u32 %v4274_v31, %v3109_v30  ;;  %v3039_v18 = vld [vmem:[%s6470_s3 + $0x238] sm:$0xf0]  ;;  %v3031_v30 = vld [vmem:[%s6470_s3 + $0x228] sm:$0xf0] }
  0x44   :  { %640 = vmatpush.bf16.msra.mxu0 %v2913_v35  ;;  %v4235_v35 = vld [vmem:[%s6470_s3 + $0x194] sm:$0xf] }
  0x45   :  { %653 = vmatpush.bf16.msra.mxu1 %v2977_v25  ;;  %v2934_v25 = vld [vmem:[%s6470_s3 + $0x1a8] sm:$0xf0]  ;;  %v2929_v38 = vor.u32 %v4235_v35, %v2926_v37  ;;  %v4259_v35 = vld [vmem:[%s6470_s3 + $0x254] sm:$0xf] }
  0x46   :  { %v2937_v26 = vor.u32 %v4237_v23, %v2934_v25  ;;  %619 = vmatpush.bf16.msrb.mxu2 %v2869_v42  ;;  %v4262_v23 = vld [vmem:[%s6470_s3 + $0x264] sm:$0xf0]  ;;  %v4261_v25 = vld [vmem:[%s6470_s3 + $0x264] sm:$0xf]  ;;  %v3111_v37 = vld [vmem:[%s6470_s3 + $0x2c8] sm:$0xf0] }
  0x47   :  { %v3062_v24 = vor.u32 %v4262_v23, %v3061_v22  ;;  %v4267_v23 = vld [vmem:[%s6470_s3 + $0x294] sm:$0xf] }
  0x48   :  { %641 = vmatpush.bf16.msra.mxu0 %v2905_v46  ;;  %v4234_v46 = vld [vmem:[%s6470_s3 + $0x184] sm:$0xf0] }
  0x49   :  { %654 = vmatpush.bf16.msra.mxu1 %v2969_v33  ;;  %v2924_v33 = vld [vmem:[%s6470_s3 + $0x190] sm:$0xf]  ;;  %v2917_v48 = vor.u32 %v4234_v46, %v2916_v45 }
  0x4a   :  { %v2925_v36 = vor.u32 %v4236_v34, %v2924_v33  ;;  %620 = vmatpush.bf16.msrb.mxu2 %v2861_v54  ;;  %v3053_v33 = vld [vmem:[%s6470_s3 + $0x250] sm:$0xf]  ;;  %v4260_v34 = vld [vmem:[%s6470_s3 + $0x254] sm:$0xf0] }
  0x4b   :  { %v3054_v39 = vor.u32 %v4260_v34, %v3053_v33  ;;  %v4266_v33 = vld [vmem:[%s6470_s3 + $0x284] sm:$0xf0]  ;;  %v4265_v34 = vld [vmem:[%s6470_s3 + $0x284] sm:$0xf] }
  0x4c   :  { %642 = vmatpush.bf16.msra.mxu0 %v2897_v57  ;;  %633 = vmatpush.bf16.msrb.mxu3 %v2925_v36  ;;  %v2852_v57 = vld [vmem:[%s6470_s3 + $0x100] sm:$0xf]  ;;  %v4273_v36 = vld [vmem:[%s6470_s3 + $0x2c4] sm:$0xf] }
  0x4d   :  { %655 = vmatpush.bf16.msra.mxu1 %v2961_v49  ;;  %v2918_v49 = vld [vmem:[%s6470_s3 + $0x188] sm:$0xf0]  ;;  %v2853_v60 = vor.u32 %v4218_v58, %v2852_v57  ;;  %v3114_v43 = vor.u32 %v4273_v36, %v3111_v37 }
  0x4e   :  { %v2921_v50 = vor.u32 %v4233_v47, %v2918_v49  ;;  %v3079_v36 = vld [vmem:[%s6470_s3 + $0x288] sm:$0xf0] }
  0x4f   :  { %621 = vmatpush.bf16.msrb.mxu2 %v2853_v60  ;;  %v3101_v60 = vld [vmem:[%s6470_s3 + $0x2b0] sm:$0xf]  ;;  %v3082_v37 = vor.u32 %v4265_v34, %v3079_v36  ;;  %v4306_v36 = vld [vmem:[%s6470_s3 + $0x3c4] sm:$0xf0] }
  0x50   :  { %643 = vmatpush.bf16.msra.mxu0 %v2889_v20  ;;  %634 = vmatpush.bf16.msrb.mxu3 %v2917_v48  ;;  %v4275_v20 = vld [vmem:[%s6470_s3 + $0x2d4] sm:$0xf] }
  0x51   :  { %656 = vmatpush.bf16.msra.mxu1 %v2953_v59  ;;  %v4217_v59 = vld [vmem:[%s6470_s3 + $0x104] sm:$0xf] }
  0x52   :  { %v2857_v62 = vor.u32 %v4217_v59, %v2854_v61  ;;  %v4272_v61 = vld [vmem:[%s6470_s3 + $0x2b4] sm:$0xf0] }
  0x54   :  { %644 = vmatpush.bf16.msra.mxu0 %v2881_v32  ;;  %v3122_v32 = vor.u32 %v4275_v20, %v3119_v21  ;;  %v3085_v20 = vld [vmem:[%s6470_s3 + $0x290] sm:$0xf]  ;;  %v4268_v21 = vld [vmem:[%s6470_s3 + $0x294] sm:$0xf0] }
  0x55   :  { %657 = vmatpush.bf16.msra.mxu1 %v2945_v3  ;;  %v3135_v3 = vld [vmem:[%s6470_s3 + $0x2f8] sm:$0xf0]  ;;  %v3086_v22 = vor.u32 %v4268_v21, %v3085_v20 }
  0x58   :  { %645 = vmatpush.bf16.msra.mxu0 %v2873_v44 }
  0x59   :  { %658 = vmatpush.bf16.msra.mxu1 %v2937_v26  ;;  %v3063_v26 = vld [vmem:[%s6470_s3 + $0x268] sm:$0xf0] }
  0x5a   :  { %v3066_v29 = vor.u32 %v4261_v25, %v3063_v26  ;;  %v3029_v26 = vld [vmem:[%s6470_s3 + $0x220] sm:$0xf] }
  0x5c   :  { %646 = vmatpush.bf16.msra.mxu0 %v2865_v56 }
  0x5d   :  { %659 = vmatpush.bf16.msra.mxu1 %v2929_v38  ;;  %v3055_v38 = vld [vmem:[%s6470_s3 + $0x258] sm:$0xf0] }
  0x5e   :  { %v3058_v40 = vor.u32 %v4259_v35, %v3055_v38  ;;  %v3021_v38 = vld [vmem:[%s6470_s3 + $0x210] sm:$0xf] }
  0x60   :  { %647 = vmatpush.bf16.msra.mxu0 %v2857_v62  ;;  %v4271_v62 = vld [vmem:[%s6470_s3 + $0x2b4] sm:$0xf] }
  0x61   :  { %660 = vmatpush.bf16.msra.mxu1 %v2921_v50 }
  0xa0   :  { %v139_v5 = vpop.f32.mrf.mxu0 }
  0xa1   :  { %v140_v6 = vadd.f32 %v139_v5, %v46_v2  ;;  %v152_v7 = vpop.f32.mrf.mxu1  ;;  %v3134_v2 = vor.u32 %v4280_v0, %v3133_v63  ;;  %v4278_v5 = vld [vmem:[%s6470_s3 + $0x2e4] sm:$0xf0]  ;;  %v3102_v63 = vor.u32 %v4272_v61, %v3101_v60  ;;  %v3103_v0 = vld [vmem:[%s6470_s3 + $0x2b8] sm:$0xf0]  ;;  %v3230_v60 = vld [vmem:[%s6470_s3 + $0x370] sm:$0xf] }
  0xa2   :  { %v153_v8 = vadd.f32 %v152_v7, %v47_v4  ;;  %v3125_v4 = vld [vmem:[%s6470_s3 + $0x2e0] sm:$0xf]  ;;  %v3138_v7 = vor.u32 %v4279_v1, %v3135_v3  ;;  %v3106_v1 = vor.u32 %v4271_v62, %v3103_v0  ;;  %v4258_v3 = vld [vmem:[%s6470_s3 + $0x244] sm:$0xf0]  ;;  %v4296_v62 = vld [vmem:[%s6470_s3 + $0x374] sm:$0xf0] }
  0xa3   :  { %4490 = vtanh.f32 %v140_v6  ;;  %v192_v6 = vld [vmem:[%s6473_s4] sm:$0x3]  ;;  %v3232_v0 = vld [vmem:[%s6470_s3 + $0x378] sm:$0xf0] }
  0xa4   :  { %4492 = vtanh.f32 %v153_v8  ;;  %v4277_v8 = vld [vmem:[%s6470_s3 + $0x2e4] sm:$0xf]  ;;  %v195_v27 = vperm.slane %v192_v6, 1  ;;  %v194_v47 = vperm.slane %v192_v6, 0  ;;  %v3047_v6 = vld [vmem:[%s6470_s3 + $0x248] sm:$0xf0] }
  0xa8   :  { %v141_v9 = vpop.f32.mrf.mxu0 }
  0xa9   :  { %v4491_v10 = vpop.eup %4490  ;;  %v154_v11 = vpop.f32.mrf.mxu1  ;;  %v3127_v9 = vld [vmem:[%s6470_s3 + $0x2e8] sm:$0xf0] }
  0xaa   :  { %v4493_v12 = vpop.eup %4492  ;;  %v158_v13 = vpack.c.bf16 %v4491_v10, %v4491_v10  ;;  %v3069_v10 = vld [vmem:[%s6470_s3 + $0x270] sm:$0xf]  ;;  %v3126_v11 = vor.u32 %v4278_v5, %v3125_v4  ;;  %v3130_v15 = vor.u32 %v4277_v8, %v3127_v9  ;;  %v4257_v4 = vld [vmem:[%s6470_s3 + $0x244] sm:$0xf]  ;;  %v4270_v8 = vld [vmem:[%s6470_s3 + $0x2a4] sm:$0xf0] }
  0xab   :  { %v159_v14 = vpack.c.bf16 %v4493_v12, %v4493_v12  ;;  %v4264_v12 = vld [vmem:[%s6470_s3 + $0x274] sm:$0xf0]  ;;  %v3050_v9 = vor.u32 %v4257_v4, %v3047_v6  ;;  %v3278_v4 = vld [vmem:[%s6470_s3 + $0x3d0] sm:$0xf]  ;;  %v4307_v6 = vld [vmem:[%s6470_s3 + $0x3d4] sm:$0xf] }
  0xac   :  { %366 = vmatmul.bf16.vlgmr.msra.gmra.mxu2 %v158_v13  ;;  %392 = vmatmul.bf16.vlgmr.msrb.gmra.mxu0 %v158_v13  ;;  %v4263_v13 = vld [vmem:[%s6470_s3 + $0x274] sm:$0xf]  ;;  %v3070_v16 = vor.u32 %v4264_v12, %v3069_v10  ;;  %v3095_v12 = vld [vmem:[%s6470_s3 + $0x2a8] sm:$0xf0] }
  0xad   :  { %379 = vmatmul.bf16.vlgmr.msra.gmra.mxu3 %v159_v14  ;;  %405 = vmatmul.bf16.vlgmr.msrb.gmra.mxu1 %v159_v14  ;;  %v3071_v14 = vld [vmem:[%s6470_s3 + $0x278] sm:$0xf0] }
  0xae   :  { %883 = vmatpush.bf16.msra.mxu3 %v3134_v2  ;;  %909 = vmatpush.bf16.msrb.mxu1 %v3138_v7  ;;  %v3074_v17 = vor.u32 %v4263_v13, %v3071_v14  ;;  %v3045_v2 = vld [vmem:[%s6470_s3 + $0x240] sm:$0xf]  ;;  %v3037_v14 = vld [vmem:[%s6470_s3 + $0x230] sm:$0xf] }
  0xaf   :  { %870 = vmatpush.bf16.msra.mxu2 %v3070_v16  ;;  %v3046_v5 = vor.u32 %v4258_v3, %v3045_v2  ;;  %v3093_v7 = vld [vmem:[%s6470_s3 + $0x2a0] sm:$0xf]  ;;  %v4255_v16 = vld [vmem:[%s6470_s3 + $0x234] sm:$0xf]  ;;  %v3231_v2 = vor.u32 %v4296_v62, %v3230_v60  ;;  %v4302_v60 = vld [vmem:[%s6470_s3 + $0x3a4] sm:$0xf0] }
  0xb0   :  { %896 = vmatpush.bf16.msrb.mxu0 %v3074_v17  ;;  %v3094_v10 = vor.u32 %v4270_v8, %v3093_v7  ;;  %v3042_v19 = vor.u32 %v4255_v16, %v3039_v18  ;;  %v3280_v7 = vld [vmem:[%s6470_s3 + $0x3d8] sm:$0xf0]  ;;  %v3222_v8 = vld [vmem:[%s6470_s3 + $0x360] sm:$0xf] }
  0xb2   :  { %884 = vmatpush.bf16.msra.mxu3 %v3126_v11  ;;  %910 = vmatpush.bf16.msrb.mxu1 %v3130_v15  ;;  %v4269_v11 = vld [vmem:[%s6470_s3 + $0x2a4] sm:$0xf]  ;;  %v4256_v15 = vld [vmem:[%s6470_s3 + $0x234] sm:$0xf0] }
  0xb3   :  { %871 = vmatpush.bf16.msra.mxu2 %v3062_v24  ;;  %v3098_v13 = vor.u32 %v4269_v11, %v3095_v12  ;;  %v3038_v17 = vor.u32 %v4256_v15, %v3037_v14  ;;  %v3087_v24 = vld [vmem:[%s6470_s3 + $0x298] sm:$0xf0]  ;;  %v4293_v11 = vld [vmem:[%s6470_s3 + $0x364] sm:$0xf]  ;;  %v3224_v12 = vld [vmem:[%s6470_s3 + $0x368] sm:$0xf0]  ;;  %v3283_v15 = vor.u32 %v4307_v6, %v3280_v7 }
  0xb4   :  { %897 = vmatpush.bf16.msrb.mxu0 %v3066_v29  ;;  %v3090_v25 = vor.u32 %v4267_v23, %v3087_v24  ;;  %v3227_v14 = vor.u32 %v4293_v11, %v3224_v12  ;;  %v3246_v7 = vld [vmem:[%s6470_s3 + $0x390] sm:$0xf]  ;;  %v3248_v11 = vld [vmem:[%s6470_s3 + $0x398] sm:$0xf0] }
  0xb6   :  { %885 = vmatpush.bf16.msra.mxu3 %v3118_v28  ;;  %911 = vmatpush.bf16.msrb.mxu1 %v3122_v32  ;;  %v4253_v28 = vld [vmem:[%s6470_s3 + $0x224] sm:$0xf]  ;;  %v3077_v32 = vld [vmem:[%s6470_s3 + $0x280] sm:$0xf] }
  0xb7   :  { %872 = vmatpush.bf16.msra.mxu2 %v3054_v39  ;;  %v3034_v31 = vor.u32 %v4253_v28, %v3031_v30  ;;  %v3078_v35 = vor.u32 %v4266_v33, %v3077_v32  ;;  %v4252_v39 = vld [vmem:[%s6470_s3 + $0x214] sm:$0xf0] }
  0xb8   :  { %898 = vmatpush.bf16.msrb.mxu0 %v3058_v40  ;;  %v3022_v40 = vor.u32 %v4252_v39, %v3021_v38  ;;  %v3272_v39 = vld [vmem:[%s6470_s3 + $0x3c8] sm:$0xf0] }
  0xba   :  { %886 = vmatpush.bf16.msra.mxu3 %v3110_v41  ;;  %912 = vmatpush.bf16.msrb.mxu1 %v3114_v43  ;;  %v4251_v41 = vld [vmem:[%s6470_s3 + $0x214] sm:$0xf] }
  0xbb   :  { %873 = vmatpush.bf16.msra.mxu2 %v3046_v5  ;;  %v4308_v5 = vld [vmem:[%s6470_s3 + $0x3d4] sm:$0xf0] }
  0xbc   :  { %899 = vmatpush.bf16.msrb.mxu0 %v3050_v9  ;;  %v4294_v9 = vld [vmem:[%s6470_s3 + $0x364] sm:$0xf0] }
  0xbe   :  { %887 = vmatpush.bf16.msra.mxu3 %v3102_v63  ;;  %913 = vmatpush.bf16.msrb.mxu1 %v3106_v1  ;;  %v4295_v63 = vld [vmem:[%s6470_s3 + $0x374] sm:$0xf] }
  0xbf   :  { %874 = vmatpush.bf16.msra.mxu2 %v3038_v17  ;;  %v3235_v3 = vor.u32 %v4295_v63, %v3232_v0  ;;  %v2849_v17 = vld [vmem:[%s6473_s4 + $0x2] sm:$0x3]  ;;  %v3256_v63 = vld [vmem:[%s6470_s3 + $0x3a8] sm:$0xf0] }
  0xc0   :  { %900 = vmatpush.bf16.msrb.mxu0 %v3042_v19  ;;  %v451_v18 = vperm.slane %v2849_v17, 1  ;;  %v450_v24 = vperm.slane %v2849_v17, 0  ;;  %v3192_v17 = vld [vmem:[%s6470_s3 + $0x328] sm:$0xf0] }
  0xc2   :  { %888 = vmatpush.bf16.msra.mxu3 %v3094_v10  ;;  %914 = vmatpush.bf16.msrb.mxu1 %v3098_v13  ;;  %v3223_v10 = vor.u32 %v4294_v9, %v3222_v8  ;;  %v3279_v13 = vor.u32 %v4308_v5, %v3278_v4  ;;  %v3200_v5 = vld [vmem:[%s6470_s3 + $0x338] sm:$0xf0]  ;;  %v4300_v8 = vld [vmem:[%s6470_s3 + $0x394] sm:$0xf0]  ;;  %v4299_v9 = vld [vmem:[%s6470_s3 + $0x394] sm:$0xf] }
  0xc3   :  { %v3251_v12 = vor.u32 %v4299_v9, %v3248_v11 }
  0xc4   :  { %901 = vmatpush.bf16.msrb.mxu0 %v3034_v31 }
  0xc6   :  { %889 = vmatpush.bf16.msra.mxu3 %v3086_v22  ;;  %915 = vmatpush.bf16.msrb.mxu1 %v3090_v25 }
  0xca   :  { %890 = vmatpush.bf16.msra.mxu3 %v3078_v35  ;;  %916 = vmatpush.bf16.msrb.mxu1 %v3082_v37  ;;  %v3270_v35 = vld [vmem:[%s6470_s3 + $0x3c0] sm:$0xf]  ;;  %v4305_v37 = vld [vmem:[%s6470_s3 + $0x3c4] sm:$0xf] }
  0xcb   :  { %v3271_v38 = vor.u32 %v4306_v36, %v3270_v35  ;;  %v3176_v35 = vld [vmem:[%s6470_s3 + $0x308] sm:$0xf0] }
 0x129   :  { %v393_v42 = vpop.f32.mrf.mxu0 }
 0x12a   :  { %v394_v44 = vadd.f32 %v393_v42, %v195_v27  ;;  %v406_v45 = vpop.f32.mrf.mxu1  ;;  %v4254_v27 = vld [vmem:[%s6470_s3 + $0x224] sm:$0xf0]  ;;  %v3023_v42 = vld [vmem:[%s6470_s3 + $0x218] sm:$0xf0] }
 0x12b   :  { %v3030_v29 = vor.u32 %v4254_v27, %v3029_v26  ;;  %v3026_v43 = vor.u32 %v4251_v41, %v3023_v42  ;;  %v4292_v41 = vld [vmem:[%s6470_s3 + $0x354] sm:$0xf0]  ;;  %v3275_v42 = vor.u32 %v4305_v37, %v3272_v39  ;;  %v3455_v37 = vld [vmem:[%s6470_s3 + $0x4f0] sm:$0xf]  ;;  %v4343_v39 = vld [vmem:[%s6470_s3 + $0x4f4] sm:$0xf] }
 0x12c   :  { %v407_v46 = vadd.f32 %v406_v45, %v394_v44  ;;  %v3013_v44 = vld [vmem:[%s6470_s3 + $0x200] sm:$0xf]  ;;  %v4250_v45 = vld [vmem:[%s6470_s3 + $0x204] sm:$0xf0] }
 0x12d   :  { %875 = vmatpush.bf16.msra.mxu2 %v3030_v29  ;;  %902 = vmatpush.bf16.msrb.mxu0 %v3026_v43 }
 0x12e   :  { %4494 = vtanh.f32 %v407_v46  ;;  %v4249_v46 = vld [vmem:[%s6470_s3 + $0x204] sm:$0xf] }
 0x12f   :  { %v367_v48 = vpop.f32.mrf.mxu2 }
 0x130   :  { %v368_v49 = vadd.f32 %v367_v48, %v194_v47  ;;  %v380_v50 = vpop.f32.mrf.mxu3  ;;  %v3014_v47 = vor.u32 %v4250_v45, %v3013_v44  ;;  %v3015_v48 = vld [vmem:[%s6470_s3 + $0x208] sm:$0xf0]  ;;  %v4291_v44 = vld [vmem:[%s6470_s3 + $0x354] sm:$0xf]  ;;  %v3216_v45 = vld [vmem:[%s6470_s3 + $0x358] sm:$0xf0] }
 0x131   :  { %v395_v51 = vpop.f32.mrf.mxu0  ;;  %876 = vmatpush.bf16.msra.mxu2 %v3022_v40  ;;  %v3214_v40 = vld [vmem:[%s6470_s3 + $0x350] sm:$0xf] }
 0x132   :  { %v381_v52 = vadd.f32 %v380_v50, %v368_v49  ;;  %v408_v53 = vpop.f32.mrf.mxu1  ;;  %v3018_v49 = vor.u32 %v4249_v46, %v3015_v48  ;;  %v3294_v50 = vld [vmem:[%s6470_s3 + $0x3f0] sm:$0xf]  ;;  %v4312_v51 = vld [vmem:[%s6470_s3 + $0x3f4] sm:$0xf0]  ;;  %v3215_v43 = vor.u32 %v4292_v41, %v3214_v40  ;;  %v3457_v41 = vld [vmem:[%s6470_s3 + $0x4f8] sm:$0xf0] }
 0x133   :  { %v3295_v53 = vor.u32 %v4312_v51, %v3294_v50  ;;  %v3262_v46 = vld [vmem:[%s6470_s3 + $0x3b0] sm:$0xf]  ;;  %v4304_v48 = vld [vmem:[%s6470_s3 + $0x3b4] sm:$0xf0]  ;;  %v3264_v50 = vld [vmem:[%s6470_s3 + $0x3b8] sm:$0xf0] }
 0x134   :  { %v4495_v54 = vpop.eup %4494  ;;  %4496 = vtanh.f32 %v381_v52  ;;  %903 = vmatpush.bf16.msrb.mxu0 %v3018_v49  ;;  %v4311_v52 = vld [vmem:[%s6470_s3 + $0x3f4] sm:$0xf]  ;;  %v3263_v51 = vor.u32 %v4304_v48, %v3262_v46  ;;  %v3449_v46 = vld [vmem:[%s6470_s3 + $0x4e8] sm:$0xf0] }
 0x135   :  { %v413_v55 = vpack.c.bf16 %v4495_v54, %v4495_v54  ;;  %877 = vmatpush.bf16.msra.mxu2 %v3014_v47  ;;  %v3296_v54 = vld [vmem:[%s6470_s3 + $0x3f8] sm:$0xf0]  ;;  %v3219_v47 = vor.u32 %v4291_v44, %v3216_v45  ;;  %v4303_v49 = vld [vmem:[%s6470_s3 + $0x3b4] sm:$0xf]  ;;  %v3460_v44 = vor.u32 %v4343_v39, %v3457_v41  ;;  %v4341_v45 = vld [vmem:[%s6470_s3 + $0x4e4] sm:$0xf] }
 0x136   :  { %v4322_v41 = vld [vmem:[%s6470_s3 + $0x444] sm:$0xf0] }
 0x137   :  { %v369_v56 = vpop.f32.mrf.mxu2  ;;  %635 = vmatmul.bf16.vlgmr.msrb.gmra.mxu3 %v413_v55  ;;  %661 = vmatmul.bf16.vlgmr.msra.gmra.mxu1 %v413_v55  ;;  %v3286_v55 = vld [vmem:[%s6470_s3 + $0x3e0] sm:$0xf] }
 0x138   :  { %v382_v57 = vpop.f32.mrf.mxu3  ;;  %v4310_v56 = vld [vmem:[%s6470_s3 + $0x3e4] sm:$0xf0]  ;;  %1139 = vmatpush.bf16.msrb.mxu3 %v3295_v53  ;;  %v3206_v53 = vld [vmem:[%s6470_s3 + $0x340] sm:$0xf] }
 0x139   :  { %v3299_v57 = vor.u32 %v4311_v52, %v3296_v54  ;;  %v3287_v61 = vor.u32 %v4310_v56, %v3286_v55  ;;  %v3267_v52 = vor.u32 %v4303_v49, %v3264_v50  ;;  %v4290_v54 = vld [vmem:[%s6470_s3 + $0x344] sm:$0xf0]  ;;  %v4289_v56 = vld [vmem:[%s6470_s3 + $0x344] sm:$0xf]  ;;  %v4328_v49 = vld [vmem:[%s6470_s3 + $0x474] sm:$0xf0] }
 0x13a   :  { %v4497_v58 = vpop.eup %4496  ;;  %v3207_v55 = vor.u32 %v4290_v54, %v3206_v53  ;;  %v4327_v50 = vld [vmem:[%s6470_s3 + $0x474] sm:$0xf] }
 0x13b   :  { %v412_v59 = vpack.c.bf16 %v4497_v58, %v4497_v58  ;;  %v4309_v58 = vld [vmem:[%s6470_s3 + $0x3e4] sm:$0xf]  ;;  %1165 = vmatpush.bf16.msra.mxu1 %v3299_v57  ;;  %v3208_v57 = vld [vmem:[%s6470_s3 + $0x348] sm:$0xf0] }
 0x13c   :  { %1140 = vmatpush.bf16.msrb.mxu3 %v3287_v61  ;;  %v4301_v61 = vld [vmem:[%s6470_s3 + $0x3a4] sm:$0xf] }
 0x13d   :  { %622 = vmatmul.bf16.vlgmr.msrb.gmra.mxu2 %v412_v59  ;;  %648 = vmatmul.bf16.vlgmr.msra.gmra.mxu0 %v412_v59  ;;  %v3288_v59 = vld [vmem:[%s6470_s3 + $0x3e8] sm:$0xf0]  ;;  %v3259_v0 = vor.u32 %v4301_v61, %v3256_v63 }
 0x13e   :  { %v3291_v1 = vor.u32 %v4309_v58, %v3288_v59  ;;  %1126 = vmatpush.bf16.msrb.mxu2 %v3231_v2  ;;  %1152 = vmatpush.bf16.msra.mxu0 %v3235_v3  ;;  %v3211_v58 = vor.u32 %v4289_v56, %v3208_v57  ;;  %v3254_v59 = vld [vmem:[%s6470_s3 + $0x3a0] sm:$0xf]  ;;  %v4288_v2 = vld [vmem:[%s6470_s3 + $0x334] sm:$0xf0]  ;;  %v4287_v3 = vld [vmem:[%s6470_s3 + $0x334] sm:$0xf] }
 0x13f   :  { %v3255_v62 = vor.u32 %v4302_v60, %v3254_v59  ;;  %v3203_v6 = vor.u32 %v4287_v3, %v3200_v5  ;;  %v4340_v56 = vld [vmem:[%s6470_s3 + $0x4d4] sm:$0xf0]  ;;  %v4339_v57 = vld [vmem:[%s6470_s3 + $0x4d4] sm:$0xf]  ;;  %v3383_v59 = vld [vmem:[%s6470_s3 + $0x460] sm:$0xf] }
 0x140   :  { %1166 = vmatpush.bf16.msra.mxu1 %v3291_v1  ;;  %1141 = vmatpush.bf16.msrb.mxu3 %v3279_v13  ;;  %v3198_v1 = vld [vmem:[%s6470_s3 + $0x330] sm:$0xf]  ;;  %v3190_v13 = vld [vmem:[%s6470_s3 + $0x320] sm:$0xf]  ;;  %v4326_v60 = vld [vmem:[%s6470_s3 + $0x464] sm:$0xf0] }
 0x141   :  { %v3199_v4 = vor.u32 %v4288_v2, %v3198_v1  ;;  %v3384_v63 = vor.u32 %v4326_v60, %v3383_v59  ;;  %v3385_v1 = vld [vmem:[%s6470_s3 + $0x468] sm:$0xf0]  ;;  %v4332_v59 = vld [vmem:[%s6470_s3 + $0x494] sm:$0xf0]  ;;  %v4331_v60 = vld [vmem:[%s6470_s3 + $0x494] sm:$0xf] }
 0x142   :  { %1127 = vmatpush.bf16.msrb.mxu2 %v3223_v10  ;;  %1153 = vmatpush.bf16.msra.mxu0 %v3227_v14  ;;  %v3247_v10 = vor.u32 %v4300_v8, %v3246_v7  ;;  %v4286_v14 = vld [vmem:[%s6470_s3 + $0x324] sm:$0xf0] }
 0x144   :  { %1167 = vmatpush.bf16.msra.mxu1 %v3283_v15  ;;  %1142 = vmatpush.bf16.msrb.mxu3 %v3271_v38  ;;  %v4285_v15 = vld [vmem:[%s6470_s3 + $0x324] sm:$0xf]  ;;  %v4344_v38 = vld [vmem:[%s6470_s3 + $0x4f4] sm:$0xf0] }
 0x145   :  { %v3456_v40 = vor.u32 %v4344_v38, %v3455_v37  ;;  %v3425_v37 = vld [vmem:[%s6470_s3 + $0x4b8] sm:$0xf0] }
 0x146   :  { %1128 = vmatpush.bf16.msrb.mxu2 %v3215_v43  ;;  %1154 = vmatpush.bf16.msra.mxu0 %v3219_v47  ;;  %v4342_v43 = vld [vmem:[%s6470_s3 + $0x4e4] sm:$0xf0]  ;;  %v3391_v47 = vld [vmem:[%s6470_s3 + $0x470] sm:$0xf] }
 0x147   :  { %v3392_v53 = vor.u32 %v4328_v49, %v3391_v47  ;;  %v4334_v47 = vld [vmem:[%s6470_s3 + $0x4a4] sm:$0xf0] }
 0x148   :  { %1168 = vmatpush.bf16.msra.mxu1 %v3275_v42  ;;  %1143 = vmatpush.bf16.msrb.mxu3 %v3263_v51  ;;  %v3447_v42 = vld [vmem:[%s6470_s3 + $0x4e0] sm:$0xf]  ;;  %v3393_v51 = vld [vmem:[%s6470_s3 + $0x478] sm:$0xf0] }
 0x149   :  { %v3448_v48 = vor.u32 %v4342_v43, %v3447_v42  ;;  %v3396_v54 = vor.u32 %v4327_v50, %v3393_v51  ;;  %v4321_v43 = vld [vmem:[%s6470_s3 + $0x444] sm:$0xf]  ;;  %v3417_v50 = vld [vmem:[%s6470_s3 + $0x4a8] sm:$0xf0] }
 0x14a   :  { %1129 = vmatpush.bf16.msrb.mxu2 %v3207_v55  ;;  %1155 = vmatpush.bf16.msra.mxu0 %v3211_v58  ;;  %v3439_v55 = vld [vmem:[%s6470_s3 + $0x4d0] sm:$0xf]  ;;  %v3441_v58 = vld [vmem:[%s6470_s3 + $0x4d8] sm:$0xf0] }
 0x14b   :  { %v3440_v2 = vor.u32 %v4340_v56, %v3439_v55  ;;  %v3361_v56 = vld [vmem:[%s6470_s3 + $0x438] sm:$0xf0] }
 0x14c   :  { %1169 = vmatpush.bf16.msra.mxu1 %v3267_v52  ;;  %1144 = vmatpush.bf16.msrb.mxu3 %v3255_v62  ;;  %v3452_v52 = vor.u32 %v4341_v45, %v3449_v46  ;;  %v3010_v62 = vld [vmem:[%s6473_s4 + $0x4] sm:$0x3]  ;;  %v3415_v46 = vld [vmem:[%s6470_s3 + $0x4a0] sm:$0xf] }
 0x14d   :  { %v707_v5 = vperm.slane %v3010_v62, 1  ;;  %v706_v11 = vperm.slane %v3010_v62, 0  ;;  %v3416_v49 = vor.u32 %v4334_v47, %v3415_v46  ;;  %v3409_v62 = vld [vmem:[%s6470_s3 + $0x498] sm:$0xf0]  ;;  %v3544_v47 = vld [vmem:[%s6470_s3 + $0x560] sm:$0xf] }
 0x14e   :  { %1130 = vmatpush.bf16.msrb.mxu2 %v3199_v4  ;;  %1156 = vmatpush.bf16.msra.mxu0 %v3203_v6  ;;  %v3444_v4 = vor.u32 %v4339_v57, %v3441_v58  ;;  %v3407_v58 = vld [vmem:[%s6470_s3 + $0x490] sm:$0xf]  ;;  %v3602_v46 = vld [vmem:[%s6470_s3 + $0x5d8] sm:$0xf0] }
 0x150   :  { %1170 = vmatpush.bf16.msra.mxu1 %v3259_v0  ;;  %1145 = vmatpush.bf16.msrb.mxu3 %v3247_v10  ;;  %v4325_v0 = vld [vmem:[%s6470_s3 + $0x464] sm:$0xf] }
 0x151   :  { %v3388_v3 = vor.u32 %v4325_v0, %v3385_v1  ;;  %v3351_v0 = vld [vmem:[%s6470_s3 + $0x420] sm:$0xf]  ;;  %v4318_v1 = vld [vmem:[%s6470_s3 + $0x424] sm:$0xf0] }
 0x154   :  { %1171 = vmatpush.bf16.msra.mxu1 %v3251_v12 }
 0x1b4   :  { %v662_v16 = vpop.f32.mrf.mxu1 }
 0x1ba   :  { %v636_v19 = vpop.f32.mrf.mxu3  ;;  %v649_v20 = vpop.f32.mrf.mxu0 }
 0x1bb   :  { %v650_v21 = vadd.f32 %v649_v20, %v451_v18  ;;  %v3195_v18 = vor.u32 %v4285_v15, %v3192_v17  ;;  %v4298_v20 = vld [vmem:[%s6470_s3 + $0x384] sm:$0xf0] }
 0x1bc   :  { %v664_v22 = vpop.f32.mrf.mxu1 }
 0x1bd   :  { %v663_v23 = vadd.f32 %v662_v16, %v650_v21  ;;  %v3191_v16 = vor.u32 %v4286_v14, %v3190_v13  ;;  %v4297_v21 = vld [vmem:[%s6470_s3 + $0x384] sm:$0xf]  ;;  %1157 = vmatpush.bf16.msra.mxu0 %v3195_v18 }
 0x1bf   :  { %v667_v25 = vmax.f32 %v663_v23, 0.0  ;;  %1131 = vmatpush.bf16.msrb.mxu2 %v3191_v16  ;;  %v3240_v23 = vld [vmem:[%s6470_s3 + $0x388] sm:$0xf0] }
 0x1c0   :  { %v623_v26 = vpop.f32.mrf.mxu2 }
 0x1c1   :  { %v669_v27 = vpack.c.bf16 %v667_v25, %v667_v25  ;;  %v624_v28 = vadd.f32 %v623_v26, %v450_v24  ;;  %v3243_v24 = vor.u32 %v4297_v21, %v3240_v23  ;;  %v3182_v25 = vld [vmem:[%s6470_s3 + $0x310] sm:$0xf]  ;;  %v4284_v26 = vld [vmem:[%s6470_s3 + $0x314] sm:$0xf0]  ;;  %v4338_v23 = vld [vmem:[%s6470_s3 + $0x4c4] sm:$0xf0] }
 0x1c2   :  { %v638_v29 = vpop.f32.mrf.mxu3  ;;  %v651_v30 = vpop.f32.mrf.mxu0 }
 0x1c3   :  { %v637_v31 = vadd.f32 %v636_v19, %v624_v28  ;;  %891 = vmatmul.bf16.vlgmr.msra.gmra.mxu3 %v669_v27  ;;  %917 = vmatmul.bf16.vlgmr.msrb.gmra.mxu1 %v669_v27  ;;  %v3238_v19 = vld [vmem:[%s6470_s3 + $0x380] sm:$0xf]  ;;  %v4283_v27 = vld [vmem:[%s6470_s3 + $0x314] sm:$0xf]  ;;  %v3183_v28 = vor.u32 %v4284_v26, %v3182_v25  ;;  %v3184_v29 = vld [vmem:[%s6470_s3 + $0x318] sm:$0xf0] }
 0x1c4   :  { %v3239_v22 = vor.u32 %v4298_v20, %v3238_v19  ;;  %1172 = vmatpush.bf16.msra.mxu1 %v3243_v24  ;;  %v3187_v30 = vor.u32 %v4283_v27, %v3184_v29  ;;  %v4337_v24 = vld [vmem:[%s6470_s3 + $0x4c4] sm:$0xf]  ;;  %v3433_v26 = vld [vmem:[%s6470_s3 + $0x4c8] sm:$0xf0]  ;;  %v3375_v27 = vld [vmem:[%s6470_s3 + $0x450] sm:$0xf] }
 0x1c5   :  { %v666_v32 = vmax.f32 %v637_v31, 0.0  ;;  %1132 = vmatpush.bf16.msrb.mxu2 %v3183_v28  ;;  %v3174_v31 = vld [vmem:[%s6470_s3 + $0x300] sm:$0xf]  ;;  %v4324_v28 = vld [vmem:[%s6470_s3 + $0x454] sm:$0xf0]  ;;  %v3436_v29 = vor.u32 %v4337_v24, %v3433_v26 }
 0x1c6   :  { %1146 = vmatpush.bf16.msrb.mxu3 %v3239_v22  ;;  %1158 = vmatpush.bf16.msra.mxu0 %v3187_v30  ;;  %v3431_v22 = vld [vmem:[%s6470_s3 + $0x4c0] sm:$0xf]  ;;  %v3376_v30 = vor.u32 %v4324_v28, %v3375_v27  ;;  %v3616_v24 = vld [vmem:[%s6470_s3 + $0x5f0] sm:$0xf]  ;;  %v4375_v26 = vld [vmem:[%s6470_s3 + $0x5f4] sm:$0xf] }
 0x1c7   :  { %v668_v33 = vpack.c.bf16 %v666_v32, %v666_v32  ;;  %v4282_v32 = vld [vmem:[%s6470_s3 + $0x304] sm:$0xf0]  ;;  %v3432_v25 = vor.u32 %v4338_v23, %v3431_v22  ;;  %v3337_v22 = vld [vmem:[%s6470_s3 + $0x408] sm:$0xf0]  ;;  %v3618_v28 = vld [vmem:[%s6470_s3 + $0x5f8] sm:$0xf0] }
 0x1c8   :  { %v625_v34 = vpop.f32.mrf.mxu2  ;;  %1421 = vmatpush.bf16.msrb.mxu1 %v3460_v44  ;;  %v3369_v44 = vld [vmem:[%s6470_s3 + $0x448] sm:$0xf0] }
 0x1c9   :  { %878 = vmatmul.bf16.vlgmr.msra.gmra.mxu2 %v668_v33  ;;  %904 = vmatmul.bf16.vlgmr.msrb.gmra.mxu0 %v668_v33  ;;  %v4281_v33 = vld [vmem:[%s6470_s3 + $0x304] sm:$0xf]  ;;  %v3175_v34 = vor.u32 %v4282_v32, %v3174_v31  ;;  %v4323_v31 = vld [vmem:[%s6470_s3 + $0x454] sm:$0xf]  ;;  %v3377_v32 = vld [vmem:[%s6470_s3 + $0x458] sm:$0xf0]  ;;  %v3372_v45 = vor.u32 %v4321_v43, %v3369_v44 }
 0x1ca   :  { %v3179_v36 = vor.u32 %v4281_v33, %v3176_v35  ;;  %1395 = vmatpush.bf16.msra.mxu3 %v3456_v40  ;;  %v3423_v33 = vld [vmem:[%s6470_s3 + $0x4b0] sm:$0xf]  ;;  %v4336_v35 = vld [vmem:[%s6470_s3 + $0x4b4] sm:$0xf0]  ;;  %v3367_v40 = vld [vmem:[%s6470_s3 + $0x440] sm:$0xf] }
 0x1cb   :  { %1133 = vmatpush.bf16.msrb.mxu2 %v3175_v34  ;;  %v3380_v34 = vor.u32 %v4323_v31, %v3377_v32  ;;  %v3424_v38 = vor.u32 %v4336_v35, %v3423_v33  ;;  %v3368_v42 = vor.u32 %v4322_v41, %v3367_v40  ;;  %v3171_v31 = vld [vmem:[%s6473_s4 + $0x6] sm:$0x3]  ;;  %v3621_v32 = vor.u32 %v4375_v26, %v3618_v28  ;;  %v3552_v35 = vld [vmem:[%s6470_s3 + $0x570] sm:$0xf]  ;;  %v4372_v44 = vld [vmem:[%s6470_s3 + $0x5d4] sm:$0xf0] }
 0x1cc   :  { %1159 = vmatpush.bf16.msra.mxu0 %v3179_v36  ;;  %1422 = vmatpush.bf16.msrb.mxu1 %v3452_v52  ;;  %v4335_v36 = vld [vmem:[%s6470_s3 + $0x4b4] sm:$0xf]  ;;  %v3359_v52 = vld [vmem:[%s6470_s3 + $0x430] sm:$0xf]  ;;  %v4373_v33 = vld [vmem:[%s6470_s3 + $0x5e4] sm:$0xf] }
 0x1cd   :  { %v3428_v39 = vor.u32 %v4335_v36, %v3425_v37  ;;  %v4360_v37 = vld [vmem:[%s6470_s3 + $0x574] sm:$0xf0]  ;;  %v3600_v43 = vld [vmem:[%s6470_s3 + $0x5d0] sm:$0xf]  ;;  %v4354_v28 = vld [vmem:[%s6470_s3 + $0x544] sm:$0xf0] }
 0x1ce   :  { %1396 = vmatpush.bf16.msra.mxu3 %v3448_v48  ;;  %v4333_v48 = vld [vmem:[%s6470_s3 + $0x4a4] sm:$0xf]  ;;  %v3553_v41 = vor.u32 %v4360_v37, %v3552_v35  ;;  %v3578_v37 = vld [vmem:[%s6470_s3 + $0x5a8] sm:$0xf0] }
 0x1cf   :  { %1382 = vmatpush.bf16.msra.mxu2 %v3392_v53  ;;  %v3420_v51 = vor.u32 %v4333_v48, %v3417_v50  ;;  %v4320_v53 = vld [vmem:[%s6470_s3 + $0x434] sm:$0xf0]  ;;  %v4358_v48 = vld [vmem:[%s6470_s3 + $0x564] sm:$0xf0] }
 0x1d0   :  { %1408 = vmatpush.bf16.msrb.mxu0 %v3396_v54  ;;  %1423 = vmatpush.bf16.msrb.mxu1 %v3444_v4  ;;  %v4319_v54 = vld [vmem:[%s6470_s3 + $0x434] sm:$0xf]  ;;  %v3360_v55 = vor.u32 %v4320_v53, %v3359_v52  ;;  %v3353_v4 = vld [vmem:[%s6470_s3 + $0x428] sm:$0xf0]  ;;  %v3545_v50 = vor.u32 %v4358_v48, %v3544_v47  ;;  %v963_v53 = vperm.slane %v3171_v31, 1 }
 0x1d1   :  { %v3364_v57 = vor.u32 %v4319_v54, %v3361_v56  ;;  %v3546_v52 = vld [vmem:[%s6470_s3 + $0x568] sm:$0xf0]  ;;  %v3601_v54 = vor.u32 %v4372_v44, %v3600_v43  ;;  %v3592_v56 = vld [vmem:[%s6470_s3 + $0x5c0] sm:$0xf]  ;;  %v3522_v43 = vld [vmem:[%s6470_s3 + $0x538] sm:$0xf0] }
 0x1d2   :  { %1397 = vmatpush.bf16.msra.mxu3 %v3440_v2  ;;  %v4317_v2 = vld [vmem:[%s6470_s3 + $0x424] sm:$0xf]  ;;  %v4363_v48 = vld [vmem:[%s6470_s3 + $0x594] sm:$0xf] }
 0x1d3   :  { %1383 = vmatpush.bf16.msra.mxu2 %v3384_v63  ;;  %v3412_v63 = vor.u32 %v4331_v60, %v3409_v62  ;;  %v4356_v60 = vld [vmem:[%s6470_s3 + $0x554] sm:$0xf0]  ;;  %v4369_v62 = vld [vmem:[%s6470_s3 + $0x5c4] sm:$0xf] }
 0x1d4   :  { %1409 = vmatpush.bf16.msrb.mxu0 %v3388_v3  ;;  %1424 = vmatpush.bf16.msrb.mxu1 %v3436_v29  ;;  %v3352_v3 = vor.u32 %v4318_v1, %v3351_v0  ;;  %v3608_v29 = vld [vmem:[%s6470_s3 + $0x5e0] sm:$0xf]  ;;  %v3538_v0 = vld [vmem:[%s6470_s3 + $0x558] sm:$0xf0] }
 0x1d6   :  { %1398 = vmatpush.bf16.msra.mxu3 %v3432_v25  ;;  %v4376_v25 = vld [vmem:[%s6470_s3 + $0x5f4] sm:$0xf0] }
 0x1d7   :  { %1384 = vmatpush.bf16.msra.mxu2 %v3376_v30  ;;  %v3617_v27 = vor.u32 %v4376_v25, %v3616_v24  ;;  %v4374_v30 = vld [vmem:[%s6470_s3 + $0x5e4] sm:$0xf0]  ;;  %v3586_v25 = vld [vmem:[%s6470_s3 + $0x5b8] sm:$0xf0] }
 0x1d8   :  { %1410 = vmatpush.bf16.msrb.mxu0 %v3380_v34  ;;  %1425 = vmatpush.bf16.msrb.mxu1 %v3428_v39  ;;  %v3610_v34 = vld [vmem:[%s6470_s3 + $0x5e8] sm:$0xf0]  ;;  %v3609_v36 = vor.u32 %v4374_v30, %v3608_v29  ;;  %v3554_v39 = vld [vmem:[%s6470_s3 + $0x578] sm:$0xf0]  ;;  %v4353_v29 = vld [vmem:[%s6470_s3 + $0x544] sm:$0xf] }
 0x1d9   :  { %v3613_v40 = vor.u32 %v4373_v33, %v3610_v34  ;;  %v4366_v33 = vld [vmem:[%s6470_s3 + $0x5a4] sm:$0xf0] }
 0x1da   :  { %1399 = vmatpush.bf16.msra.mxu3 %v3424_v38  ;;  %v4359_v38 = vld [vmem:[%s6470_s3 + $0x574] sm:$0xf] }
 0x1db   :  { %1385 = vmatpush.bf16.msra.mxu2 %v3368_v42  ;;  %v3557_v42 = vor.u32 %v4359_v38, %v3554_v39  ;;  %v3520_v39 = vld [vmem:[%s6470_s3 + $0x530] sm:$0xf] }
 0x1dc   :  { %1411 = vmatpush.bf16.msrb.mxu0 %v3372_v45  ;;  %1426 = vmatpush.bf16.msrb.mxu1 %v3420_v51  ;;  %v4371_v45 = vld [vmem:[%s6470_s3 + $0x5d4] sm:$0xf]  ;;  %v4357_v51 = vld [vmem:[%s6470_s3 + $0x564] sm:$0xf] }
 0x1de   :  { %1400 = vmatpush.bf16.msra.mxu3 %v3416_v49 }
 0x1df   :  { %1386 = vmatpush.bf16.msra.mxu2 %v3360_v55  ;;  %v3549_v55 = vor.u32 %v4357_v51, %v3546_v52  ;;  %v3512_v51 = vld [vmem:[%s6470_s3 + $0x520] sm:$0xf]  ;;  %v4350_v52 = vld [vmem:[%s6470_s3 + $0x524] sm:$0xf0] }
 0x1e0   :  { %1412 = vmatpush.bf16.msrb.mxu0 %v3364_v57  ;;  %1427 = vmatpush.bf16.msrb.mxu1 %v3412_v63  ;;  %v4370_v57 = vld [vmem:[%s6470_s3 + $0x5c4] sm:$0xf0]  ;;  %v3594_v63 = vld [vmem:[%s6470_s3 + $0x5c8] sm:$0xf0] }
 0x1e3   :  { %1387 = vmatpush.bf16.msra.mxu2 %v3352_v3  ;;  %v3593_v3 = vor.u32 %v4370_v57, %v3592_v56  ;;  %v3560_v57 = vld [vmem:[%s6470_s3 + $0x580] sm:$0xf] }
 0x240   :  { %v918_v61 = vpop.f32.mrf.mxu1 }
 0x246   :  { %v892_v6 = vpop.f32.mrf.mxu3  ;;  %v905_v7 = vpop.f32.mrf.mxu0 }
 0x247   :  { %v906_v8 = vadd.f32 %v905_v7, %v707_v5  ;;  %v3356_v5 = vor.u32 %v4317_v2, %v3353_v4  ;;  %v4330_v7 = vld [vmem:[%s6470_s3 + $0x484] sm:$0xf0] }
 0x248   :  { %v920_v9 = vpop.f32.mrf.mxu1 }
 0x249   :  { %v919_v10 = vadd.f32 %v918_v61, %v906_v8  ;;  %v3408_v61 = vor.u32 %v4332_v59, %v3407_v58  ;;  %v4329_v8 = vld [vmem:[%s6470_s3 + $0x484] sm:$0xf]  ;;  %1413 = vmatpush.bf16.msrb.mxu0 %v3356_v5  ;;  %v3605_v58 = vor.u32 %v4371_v45, %v3602_v46  ;;  %v3536_v59 = vld [vmem:[%s6470_s3 + $0x550] sm:$0xf]  ;;  %v4364_v46 = vld [vmem:[%s6470_s3 + $0x594] sm:$0xf0] }
 0x24a   :  { %v3537_v1 = vor.u32 %v4356_v60, %v3536_v59  ;;  %v3568_v45 = vld [vmem:[%s6470_s3 + $0x590] sm:$0xf]  ;;  %v4361_v59 = vld [vmem:[%s6470_s3 + $0x584] sm:$0xf] }
 0x24b   :  { %4498 = vtanh.f32 %v919_v10  ;;  %1401 = vmatpush.bf16.msra.mxu3 %v3408_v61  ;;  %v3401_v10 = vld [vmem:[%s6470_s3 + $0x488] sm:$0xf0]  ;;  %v4355_v61 = vld [vmem:[%s6470_s3 + $0x554] sm:$0xf]  ;;  %v3569_v47 = vor.u32 %v4364_v46, %v3568_v45 }
 0x24c   :  { %v879_v12 = vpop.f32.mrf.mxu2  ;;  %v3541_v2 = vor.u32 %v4355_v61, %v3538_v0  ;;  %v3562_v61 = vld [vmem:[%s6470_s3 + $0x588] sm:$0xf0]  ;;  %v4348_v0 = vld [vmem:[%s6470_s3 + $0x514] sm:$0xf0] }
 0x24d   :  { %v880_v13 = vadd.f32 %v879_v12, %v706_v11  ;;  %v3404_v11 = vor.u32 %v4329_v8, %v3401_v10  ;;  %v3343_v12 = vld [vmem:[%s6470_s3 + $0x410] sm:$0xf]  ;;  %v962_v10 = vperm.slane %v3171_v31, 0  ;;  %v3530_v31 = vld [vmem:[%s6470_s3 + $0x548] sm:$0xf0] }
 0x24e   :  { %v894_v14 = vpop.f32.mrf.mxu3  ;;  %v907_v15 = vpop.f32.mrf.mxu0  ;;  %v3533_v34 = vor.u32 %v4353_v29, %v3530_v31  ;;  %v3761_v29 = vld [vmem:[%s6470_s3 + $0x6d0] sm:$0xf]  ;;  %v4403_v31 = vld [vmem:[%s6470_s3 + $0x6d4] sm:$0xf] }
 0x24f   :  { %v893_v16 = vadd.f32 %v892_v6, %v880_v13  ;;  %v3399_v6 = vld [vmem:[%s6470_s3 + $0x480] sm:$0xf]  ;;  %v4316_v13 = vld [vmem:[%s6470_s3 + $0x414] sm:$0xf0]  ;;  %v4315_v14 = vld [vmem:[%s6470_s3 + $0x414] sm:$0xf]  ;;  %1428 = vmatpush.bf16.msrb.mxu1 %v3404_v11 }
 0x250   :  { %v3400_v9 = vor.u32 %v4330_v7, %v3399_v6  ;;  %v3344_v15 = vor.u32 %v4316_v13, %v3343_v12  ;;  %v3597_v6 = vor.u32 %v4369_v62, %v3594_v63  ;;  %v3565_v62 = vor.u32 %v4361_v59, %v3562_v61  ;;  %v3504_v63 = vld [vmem:[%s6470_s3 + $0x510] sm:$0xf]  ;;  %v4402_v61 = vld [vmem:[%s6470_s3 + $0x6c4] sm:$0xf0] }
 0x251   :  { %v4499_v17 = vpop.eup %4498  ;;  %4500 = vtanh.f32 %v893_v16  ;;  %v3345_v16 = vld [vmem:[%s6470_s3 + $0x418] sm:$0xf0] }
 0x252   :  { %v925_v18 = vpack.c.bf16 %v4499_v17, %v4499_v17  ;;  %1402 = vmatpush.bf16.msra.mxu3 %v3400_v9  ;;  %v3348_v17 = vor.u32 %v4315_v14, %v3345_v16  ;;  %1388 = vmatpush.bf16.msra.mxu2 %v3344_v15 }
 0x254   :  { %v881_v19 = vpop.f32.mrf.mxu2  ;;  %1147 = vmatmul.bf16.vlgmr.msrb.gmra.mxu3 %v925_v18  ;;  %1173 = vmatmul.bf16.vlgmr.msra.gmra.mxu1 %v925_v18  ;;  %v3335_v18 = vld [vmem:[%s6470_s3 + $0x400] sm:$0xf] }
 0x255   :  { %1414 = vmatpush.bf16.msrb.mxu0 %v3348_v17  ;;  %v4314_v19 = vld [vmem:[%s6470_s3 + $0x404] sm:$0xf0]  ;;  %1677 = vmatpush.bf16.msra.mxu1 %v3621_v32  ;;  %v3576_v32 = vld [vmem:[%s6470_s3 + $0x5a0] sm:$0xf] }
 0x256   :  { %1651 = vmatpush.bf16.msrb.mxu3 %v3617_v27  ;;  %v3528_v27 = vld [vmem:[%s6470_s3 + $0x540] sm:$0xf]  ;;  %v3577_v35 = vor.u32 %v4366_v33, %v3576_v32  ;;  %v3763_v32 = vld [vmem:[%s6470_s3 + $0x6d8] sm:$0xf0] }
 0x257   :  { %v4501_v20 = vpop.eup %4500  ;;  %v3529_v30 = vor.u32 %v4354_v28, %v3528_v27  ;;  %v3705_v33 = vld [vmem:[%s6470_s3 + $0x660] sm:$0xf] }
 0x258   :  { %v924_v21 = vpack.c.bf16 %v4501_v20, %v4501_v20  ;;  %v4313_v20 = vld [vmem:[%s6470_s3 + $0x404] sm:$0xf] }
 0x259   :  { %v3340_v23 = vor.u32 %v4313_v20, %v3337_v22  ;;  %1678 = vmatpush.bf16.msra.mxu1 %v3613_v40  ;;  %v4368_v22 = vld [vmem:[%s6470_s3 + $0x5b4] sm:$0xf0] }
 0x25a   :  { %1134 = vmatmul.bf16.vlgmr.msrb.gmra.mxu2 %v924_v21  ;;  %1160 = vmatmul.bf16.vlgmr.msra.gmra.mxu0 %v924_v21  ;;  %v3336_v21 = vor.u32 %v4314_v19, %v3335_v18  ;;  %v4352_v40 = vld [vmem:[%s6470_s3 + $0x534] sm:$0xf0] }
 0x25b   :  { %1415 = vmatpush.bf16.msrb.mxu0 %v3340_v23  ;;  %1652 = vmatpush.bf16.msrb.mxu3 %v3609_v36  ;;  %v4367_v23 = vld [vmem:[%s6470_s3 + $0x5b4] sm:$0xf]  ;;  %v4365_v36 = vld [vmem:[%s6470_s3 + $0x5a4] sm:$0xf] }
 0x25c   :  { %1389 = vmatpush.bf16.msra.mxu2 %v3336_v21  ;;  %v3584_v21 = vld [vmem:[%s6470_s3 + $0x5b0] sm:$0xf]  ;;  %v3589_v26 = vor.u32 %v4367_v23, %v3586_v25  ;;  %v3581_v38 = vor.u32 %v4365_v36, %v3578_v37  ;;  %v4392_v23 = vld [vmem:[%s6470_s3 + $0x674] sm:$0xf0]  ;;  %v3715_v25 = vld [vmem:[%s6470_s3 + $0x678] sm:$0xf0] }
 0x25d   :  { %1679 = vmatpush.bf16.msra.mxu1 %v3605_v58  ;;  %v3585_v24 = vor.u32 %v4368_v22, %v3584_v21  ;;  %v4362_v58 = vld [vmem:[%s6470_s3 + $0x584] sm:$0xf0]  ;;  %v3713_v21 = vld [vmem:[%s6470_s3 + $0x670] sm:$0xf]  ;;  %v4389_v36 = vld [vmem:[%s6470_s3 + $0x664] sm:$0xf] }
 0x25e   :  { %v3561_v60 = vor.u32 %v4362_v58, %v3560_v57  ;;  %v3714_v27 = vor.u32 %v4392_v23, %v3713_v21  ;;  %v3707_v37 = vld [vmem:[%s6470_s3 + $0x668] sm:$0xf0]  ;;  %v4398_v21 = vld [vmem:[%s6470_s3 + $0x6a4] sm:$0xf0] }
 0x25f   :  { %1664 = vmatpush.bf16.msra.mxu0 %v3557_v42  ;;  %1653 = vmatpush.bf16.msrb.mxu3 %v3601_v54  ;;  %v3521_v42 = vor.u32 %v4352_v40, %v3520_v39  ;;  %v3513_v54 = vor.u32 %v4350_v52, %v3512_v51  ;;  %v3710_v39 = vor.u32 %v4389_v36, %v3707_v37  ;;  %v3731_v36 = vld [vmem:[%s6470_s3 + $0x698] sm:$0xf0] }
 0x260   :  { %1638 = vmatpush.bf16.msrb.mxu2 %v3553_v41  ;;  %v4351_v41 = vld [vmem:[%s6470_s3 + $0x534] sm:$0xf]  ;;  %v3766_v40 = vor.u32 %v4403_v31, %v3763_v32  ;;  %v3729_v32 = vld [vmem:[%s6470_s3 + $0x690] sm:$0xf] }
 0x261   :  { %1680 = vmatpush.bf16.msra.mxu1 %v3597_v6  ;;  %v3525_v44 = vor.u32 %v4351_v41, %v3522_v43  ;;  %v4346_v6 = vld [vmem:[%s6470_s3 + $0x504] sm:$0xf0] }
 0x263   :  { %1665 = vmatpush.bf16.msra.mxu0 %v3549_v55  ;;  %1654 = vmatpush.bf16.msrb.mxu3 %v3593_v3  ;;  %v3514_v55 = vld [vmem:[%s6470_s3 + $0x528] sm:$0xf0]  ;;  %v3506_v3 = vld [vmem:[%s6470_s3 + $0x518] sm:$0xf0] }
 0x264   :  { %1639 = vmatpush.bf16.msrb.mxu2 %v3545_v50 }
 0x265   :  { %1681 = vmatpush.bf16.msra.mxu1 %v3589_v26 }
 0x267   :  { %1666 = vmatpush.bf16.msra.mxu0 %v3541_v2  ;;  %1655 = vmatpush.bf16.msrb.mxu3 %v3585_v24  ;;  %v4347_v2 = vld [vmem:[%s6470_s3 + $0x514] sm:$0xf] }
 0x268   :  { %1640 = vmatpush.bf16.msrb.mxu2 %v3537_v1  ;;  %v3505_v1 = vor.u32 %v4348_v0, %v3504_v63  ;;  %v4391_v24 = vld [vmem:[%s6470_s3 + $0x674] sm:$0xf]  ;;  %v3755_v0 = vld [vmem:[%s6470_s3 + $0x6c8] sm:$0xf0] }
 0x269   :  { %1682 = vmatpush.bf16.msra.mxu1 %v3581_v38  ;;  %v3718_v28 = vor.u32 %v4391_v24, %v3715_v25  ;;  %v3739_v24 = vld [vmem:[%s6470_s3 + $0x6a8] sm:$0xf0] }
 0x26b   :  { %1667 = vmatpush.bf16.msra.mxu0 %v3533_v34  ;;  %1656 = vmatpush.bf16.msrb.mxu3 %v3577_v35  ;;  %v4390_v34 = vld [vmem:[%s6470_s3 + $0x664] sm:$0xf0] }
 0x26c   :  { %1641 = vmatpush.bf16.msrb.mxu2 %v3529_v30  ;;  %v4404_v30 = vld [vmem:[%s6470_s3 + $0x6d4] sm:$0xf0]  ;;  %v3706_v35 = vor.u32 %v4390_v34, %v3705_v33  ;;  %v4395_v34 = vld [vmem:[%s6470_s3 + $0x694] sm:$0xf] }
 0x26d   :  { %v3762_v38 = vor.u32 %v4404_v30, %v3761_v29  ;;  %v3683_v30 = vld [vmem:[%s6470_s3 + $0x638] sm:$0xf0]  ;;  %v4396_v33 = vld [vmem:[%s6470_s3 + $0x694] sm:$0xf0]  ;;  %v3734_v37 = vor.u32 %v4395_v34, %v3731_v36 }
 0x26f   :  { %1668 = vmatpush.bf16.msra.mxu0 %v3525_v44  ;;  %1657 = vmatpush.bf16.msrb.mxu3 %v3569_v47 }
 0x270   :  { %1642 = vmatpush.bf16.msrb.mxu2 %v3521_v42  ;;  %v3332_v42 = vld [vmem:[%s6473_s4 + $0x8] sm:$0x3] }
 0x271   :  { %v1219_v43 = vperm.slane %v3332_v42, 1 }
 0x273   :  { %1658 = vmatpush.bf16.msrb.mxu3 %v3561_v60  ;;  %v3753_v60 = vld [vmem:[%s6470_s3 + $0x6c0] sm:$0xf] }
 0x274   :  { %1643 = vmatpush.bf16.msrb.mxu2 %v3513_v54  ;;  %v3754_v63 = vor.u32 %v4402_v61, %v3753_v60  ;;  %v3659_v60 = vld [vmem:[%s6470_s3 + $0x608] sm:$0xf0] }
 0x278   :  { %1644 = vmatpush.bf16.msrb.mxu2 %v3505_v1  ;;  %v3697_v1 = vld [vmem:[%s6470_s3 + $0x650] sm:$0xf] }
 0x2d1   :  { %v1174_v49 = vpop.f32.mrf.mxu1 }
 0x2d7   :  { %v1148_v4 = vpop.f32.mrf.mxu3  ;;  %v1161_v5 = vpop.f32.mrf.mxu0 }
 0x2d8   :  { %v1162_v7 = vadd.f32 %v1161_v5, %v963_v53  ;;  %v4349_v53 = vld [vmem:[%s6470_s3 + $0x524] sm:$0xf]  ;;  %v3496_v5 = vld [vmem:[%s6470_s3 + $0x500] sm:$0xf] }
 0x2d9   :  { %v1176_v8 = vpop.f32.mrf.mxu1  ;;  %v3517_v56 = vor.u32 %v4349_v53, %v3514_v55 }
 0x2da   :  { %v1175_v9 = vadd.f32 %v1174_v49, %v1162_v7  ;;  %v3570_v49 = vld [vmem:[%s6470_s3 + $0x598] sm:$0xf0]  ;;  %v4345_v7 = vld [vmem:[%s6470_s3 + $0x504] sm:$0xf]  ;;  %v3497_v8 = vor.u32 %v4346_v6, %v3496_v5  ;;  %v4387_v5 = vld [vmem:[%s6470_s3 + $0x654] sm:$0xf] }
 0x2db   :  { %v3573_v50 = vor.u32 %v4363_v48, %v3570_v49  ;;  %1669 = vmatpush.bf16.msra.mxu0 %v3517_v56  ;;  %v1218_v49 = vperm.slane %v3332_v42, 0  ;;  %v3699_v6 = vld [vmem:[%s6470_s3 + $0x658] sm:$0xf0]  ;;  %v3675_v42 = vld [vmem:[%s6470_s3 + $0x628] sm:$0xf0] }
 0x2dc   :  { %4502 = vtanh.f32 %v1175_v9  ;;  %v3498_v9 = vld [vmem:[%s6470_s3 + $0x508] sm:$0xf0]  ;;  %1645 = vmatpush.bf16.msrb.mxu2 %v3497_v8  ;;  %v3702_v8 = vor.u32 %v4387_v5, %v3699_v6  ;;  %v4437_v6 = vld [vmem:[%s6470_s3 + $0x7e4] sm:$0xf] }
 0x2dd   :  { %v1135_v11 = vpop.f32.mrf.mxu2  ;;  %1683 = vmatpush.bf16.msra.mxu1 %v3573_v50 }
 0x2de   :  { %v1136_v12 = vadd.f32 %v1135_v11, %v962_v10  ;;  %v3501_v10 = vor.u32 %v4345_v7, %v3498_v9  ;;  %v3777_v11 = vld [vmem:[%s6470_s3 + $0x6f0] sm:$0xf]  ;;  %v4400_v9 = vld [vmem:[%s6470_s3 + $0x6b4] sm:$0xf0] }
 0x2df   :  { %v1150_v13 = vpop.f32.mrf.mxu3  ;;  %v1163_v14 = vpop.f32.mrf.mxu0  ;;  %v3745_v7 = vld [vmem:[%s6470_s3 + $0x6b0] sm:$0xf] }
 0x2e0   :  { %v1149_v15 = vadd.f32 %v1148_v4, %v1136_v12  ;;  %v3509_v4 = vor.u32 %v4347_v2, %v3506_v3  ;;  %v4408_v12 = vld [vmem:[%s6470_s3 + $0x6f4] sm:$0xf0]  ;;  %v4407_v13 = vld [vmem:[%s6470_s3 + $0x6f4] sm:$0xf] }
 0x2e1   :  { %1684 = vmatpush.bf16.msra.mxu1 %v3565_v62  ;;  %v3778_v14 = vor.u32 %v4408_v12, %v3777_v11  ;;  %v4401_v62 = vld [vmem:[%s6470_s3 + $0x6c4] sm:$0xf]  ;;  %v4388_v2 = vld [vmem:[%s6470_s3 + $0x654] sm:$0xf0]  ;;  %v3747_v11 = vld [vmem:[%s6470_s3 + $0x6b8] sm:$0xf0]  ;;  %v3746_v12 = vor.u32 %v4400_v9, %v3745_v7 }
 0x2e2   :  { %v4503_v16 = vpop.eup %4502  ;;  %4504 = vtanh.f32 %v1149_v15  ;;  %1670 = vmatpush.bf16.msra.mxu0 %v3509_v4  ;;  %v3779_v15 = vld [vmem:[%s6470_s3 + $0x6f8] sm:$0xf0]  ;;  %v3758_v3 = vor.u32 %v4401_v62, %v3755_v0  ;;  %v3698_v4 = vor.u32 %v4388_v2, %v3697_v1  ;;  %v3938_v62 = vld [vmem:[%s6470_s3 + $0x7f0] sm:$0xf]  ;;  %v4439_v0 = vld [vmem:[%s6470_s3 + $0x7f4] sm:$0xf] }
 0x2e3   :  { %v1181_v17 = vpack.c.bf16 %v4503_v16, %v4503_v16  ;;  %v3769_v16 = vld [vmem:[%s6470_s3 + $0x6e0] sm:$0xf]  ;;  %v3940_v2 = vld [vmem:[%s6470_s3 + $0x7f8] sm:$0xf0]  ;;  %v3932_v7 = vld [vmem:[%s6470_s3 + $0x7e8] sm:$0xf0] }
 0x2e4   :  { %v3943_v5 = vor.u32 %v4439_v0, %v3940_v2  ;;  %v4418_v2 = vld [vmem:[%s6470_s3 + $0x744] sm:$0xf0] }
 0x2e5   :  { %v1137_v18 = vpop.f32.mrf.mxu2  ;;  %1403 = vmatmul.bf16.vlgmr.msra.gmra.mxu3 %v1181_v17  ;;  %1429 = vmatmul.bf16.vlgmr.msrb.gmra.mxu1 %v1181_v17  ;;  %v4406_v17 = vld [vmem:[%s6470_s3 + $0x6e4] sm:$0xf0] }
 0x2e6   :  { %1671 = vmatpush.bf16.msra.mxu0 %v3501_v10  ;;  %v3782_v18 = vor.u32 %v4407_v13, %v3779_v15  ;;  %1907 = vmatpush.bf16.msra.mxu3 %v3778_v14  ;;  %v3770_v22 = vor.u32 %v4406_v17, %v3769_v16  ;;  %v4399_v10 = vld [vmem:[%s6470_s3 + $0x6b4] sm:$0xf]  ;;  %v3689_v14 = vld [vmem:[%s6470_s3 + $0x640] sm:$0xf]  ;;  %v4386_v15 = vld [vmem:[%s6470_s3 + $0x644] sm:$0xf0] }
 0x2e7   :  { %v3750_v13 = vor.u32 %v4399_v10, %v3747_v11  ;;  %v3690_v16 = vor.u32 %v4386_v15, %v3689_v14  ;;  %v4385_v17 = vld [vmem:[%s6470_s3 + $0x644] sm:$0xf]  ;;  %v4424_v10 = vld [vmem:[%s6470_s3 + $0x774] sm:$0xf0]  ;;  %v4423_v11 = vld [vmem:[%s6470_s3 + $0x774] sm:$0xf] }
 0x2e8   :  { %v4505_v19 = vpop.eup %4504  ;;  %1933 = vmatpush.bf16.msrb.mxu1 %v3782_v18  ;;  %v3691_v18 = vld [vmem:[%s6470_s3 + $0x648] sm:$0xf0] }
 0x2e9   :  { %v1180_v20 = vpack.c.bf16 %v4505_v19, %v4505_v19  ;;  %v4405_v19 = vld [vmem:[%s6470_s3 + $0x6e4] sm:$0xf] }
 0x2ea   :  { %1908 = vmatpush.bf16.msra.mxu3 %v3770_v22  ;;  %v4397_v22 = vld [vmem:[%s6470_s3 + $0x6a4] sm:$0xf] }
 0x2eb   :  { %1390 = vmatmul.bf16.vlgmr.msra.gmra.mxu2 %v1180_v20  ;;  %1416 = vmatmul.bf16.vlgmr.msrb.gmra.mxu0 %v1180_v20  ;;  %v3771_v20 = vld [vmem:[%s6470_s3 + $0x6e8] sm:$0xf0]  ;;  %v3742_v25 = vor.u32 %v4397_v22, %v3739_v24 }
 0x2ec   :  { %v3774_v26 = vor.u32 %v4405_v19, %v3771_v20  ;;  %1894 = vmatpush.bf16.msra.mxu2 %v3714_v27  ;;  %1920 = vmatpush.bf16.msrb.mxu0 %v3718_v28  ;;  %v3694_v19 = vor.u32 %v4385_v17, %v3691_v18  ;;  %v3737_v20 = vld [vmem:[%s6470_s3 + $0x6a0] sm:$0xf]  ;;  %v4384_v27 = vld [vmem:[%s6470_s3 + $0x634] sm:$0xf0]  ;;  %v4383_v28 = vld [vmem:[%s6470_s3 + $0x634] sm:$0xf] }
 0x2ed   :  { %v3738_v23 = vor.u32 %v4398_v21, %v3737_v20  ;;  %v3686_v31 = vor.u32 %v4383_v28, %v3683_v30  ;;  %v4436_v17 = vld [vmem:[%s6470_s3 + $0x7d4] sm:$0xf0]  ;;  %v4435_v18 = vld [vmem:[%s6470_s3 + $0x7d4] sm:$0xf]  ;;  %v3866_v20 = vld [vmem:[%s6470_s3 + $0x760] sm:$0xf] }
 0x2ee   :  { %1934 = vmatpush.bf16.msrb.mxu1 %v3774_v26  ;;  %1909 = vmatpush.bf16.msra.mxu3 %v3762_v38  ;;  %v3681_v26 = vld [vmem:[%s6470_s3 + $0x630] sm:$0xf]  ;;  %v3673_v38 = vld [vmem:[%s6470_s3 + $0x620] sm:$0xf]  ;;  %v4422_v21 = vld [vmem:[%s6470_s3 + $0x764] sm:$0xf0] }
 0x2ef   :  { %v3682_v29 = vor.u32 %v4384_v27, %v3681_v26  ;;  %v3867_v24 = vor.u32 %v4422_v21, %v3866_v20  ;;  %v3868_v26 = vld [vmem:[%s6470_s3 + $0x768] sm:$0xf0]  ;;  %v4428_v20 = vld [vmem:[%s6470_s3 + $0x794] sm:$0xf0]  ;;  %v4427_v21 = vld [vmem:[%s6470_s3 + $0x794] sm:$0xf] }
 0x2f0   :  { %1895 = vmatpush.bf16.msra.mxu2 %v3706_v35  ;;  %1921 = vmatpush.bf16.msrb.mxu0 %v3710_v39  ;;  %v3730_v35 = vor.u32 %v4396_v33, %v3729_v32  ;;  %v4382_v39 = vld [vmem:[%s6470_s3 + $0x624] sm:$0xf0] }
 0x2f2   :  { %1935 = vmatpush.bf16.msrb.mxu1 %v3766_v40  ;;  %1910 = vmatpush.bf16.msra.mxu3 %v3754_v63  ;;  %v4381_v40 = vld [vmem:[%s6470_s3 + $0x624] sm:$0xf]  ;;  %v4440_v63 = vld [vmem:[%s6470_s3 + $0x7f4] sm:$0xf0] }
 0x2f3   :  { %v3939_v1 = vor.u32 %v4440_v63, %v3938_v62  ;;  %v3908_v62 = vld [vmem:[%s6470_s3 + $0x7b8] sm:$0xf0] }
 0x2f4   :  { %1896 = vmatpush.bf16.msra.mxu2 %v3698_v4  ;;  %1922 = vmatpush.bf16.msrb.mxu0 %v3702_v8  ;;  %v4438_v4 = vld [vmem:[%s6470_s3 + $0x7e4] sm:$0xf0]  ;;  %v3874_v8 = vld [vmem:[%s6470_s3 + $0x770] sm:$0xf] }
 0x2f5   :  { %v3875_v14 = vor.u32 %v4424_v10, %v3874_v8  ;;  %v4430_v8 = vld [vmem:[%s6470_s3 + $0x7a4] sm:$0xf0] }
 0x2f6   :  { %1936 = vmatpush.bf16.msrb.mxu1 %v3758_v3  ;;  %1911 = vmatpush.bf16.msra.mxu3 %v3746_v12  ;;  %v3930_v3 = vld [vmem:[%s6470_s3 + $0x7e0] sm:$0xf]  ;;  %v3876_v12 = vld [vmem:[%s6470_s3 + $0x778] sm:$0xf0] }
 0x2f7   :  { %v3931_v9 = vor.u32 %v4438_v4, %v3930_v3  ;;  %v3879_v15 = vor.u32 %v4423_v11, %v3876_v12  ;;  %v4417_v4 = vld [vmem:[%s6470_s3 + $0x744] sm:$0xf]  ;;  %v3900_v11 = vld [vmem:[%s6470_s3 + $0x7a8] sm:$0xf0] }
 0x2f8   :  { %1897 = vmatpush.bf16.msra.mxu2 %v3690_v16  ;;  %1923 = vmatpush.bf16.msrb.mxu0 %v3694_v19  ;;  %v3922_v16 = vld [vmem:[%s6470_s3 + $0x7d0] sm:$0xf]  ;;  %v3924_v19 = vld [vmem:[%s6470_s3 + $0x7d8] sm:$0xf0] }
 0x2f9   :  { %v3923_v27 = vor.u32 %v4436_v17, %v3922_v16  ;;  %v3844_v17 = vld [vmem:[%s6470_s3 + $0x738] sm:$0xf0] }
 0x2fa   :  { %1937 = vmatpush.bf16.msrb.mxu1 %v3750_v13  ;;  %1912 = vmatpush.bf16.msra.mxu3 %v3738_v23  ;;  %v3935_v13 = vor.u32 %v4437_v6, %v3932_v7  ;;  %v3493_v23 = vld [vmem:[%s6473_s4 + $0xa] sm:$0x3]  ;;  %v3898_v7 = vld [vmem:[%s6470_s3 + $0x7a0] sm:$0xf] }
 0x2fb   :  { %v1475_v30 = vperm.slane %v3493_v23, 1  ;;  %v1474_v36 = vperm.slane %v3493_v23, 0  ;;  %v3899_v10 = vor.u32 %v4430_v8, %v3898_v7  ;;  %v3892_v23 = vld [vmem:[%s6470_s3 + $0x798] sm:$0xf0]  ;;  %v4027_v8 = vld [vmem:[%s6470_s3 + $0x860] sm:$0xf] }
 0x2fc   :  { %1898 = vmatpush.bf16.msra.mxu2 %v3682_v29  ;;  %1924 = vmatpush.bf16.msrb.mxu0 %v3686_v31  ;;  %v3927_v29 = vor.u32 %v4435_v18, %v3924_v19  ;;  %v3890_v19 = vld [vmem:[%s6470_s3 + $0x790] sm:$0xf]  ;;  %v4085_v7 = vld [vmem:[%s6470_s3 + $0x8d8] sm:$0xf0] }
 0x2fe   :  { %1938 = vmatpush.bf16.msrb.mxu1 %v3742_v25  ;;  %1913 = vmatpush.bf16.msra.mxu3 %v3730_v35  ;;  %v4421_v25 = vld [vmem:[%s6470_s3 + $0x764] sm:$0xf] }
 0x2ff   :  { %v3871_v28 = vor.u32 %v4421_v25, %v3868_v26  ;;  %v3834_v25 = vld [vmem:[%s6470_s3 + $0x720] sm:$0xf]  ;;  %v4414_v26 = vld [vmem:[%s6470_s3 + $0x724] sm:$0xf0] }
 0x302   :  { %1939 = vmatpush.bf16.msrb.mxu1 %v3734_v37 }
 0x362   :  { %v1430_v41 = vpop.f32.mrf.mxu1 }
 0x368   :  { %v1404_v44 = vpop.f32.mrf.mxu3  ;;  %v1417_v45 = vpop.f32.mrf.mxu0 }
 0x369   :  { %v1418_v46 = vadd.f32 %v1417_v45, %v1219_v43  ;;  %v3678_v43 = vor.u32 %v4381_v40, %v3675_v42  ;;  %v4394_v45 = vld [vmem:[%s6470_s3 + $0x684] sm:$0xf0] }
 0x36a   :  { %v1432_v47 = vpop.f32.mrf.mxu1 }
 0x36b   :  { %v1431_v48 = vadd.f32 %v1430_v41, %v1418_v46  ;;  %v3674_v41 = vor.u32 %v4382_v39, %v3673_v38  ;;  %v4393_v46 = vld [vmem:[%s6470_s3 + $0x684] sm:$0xf]  ;;  %1925 = vmatpush.bf16.msrb.mxu0 %v3678_v43 }
 0x36d   :  { %v1435_v50 = vmax.f32 %v1431_v48, 0.0  ;;  %1899 = vmatpush.bf16.msra.mxu2 %v3674_v41  ;;  %v3723_v48 = vld [vmem:[%s6470_s3 + $0x688] sm:$0xf0] }
 0x36e   :  { %v1391_v51 = vpop.f32.mrf.mxu2 }
 0x36f   :  { %v1437_v52 = vpack.c.bf16 %v1435_v50, %v1435_v50  ;;  %v1392_v53 = vadd.f32 %v1391_v51, %v1218_v49  ;;  %v3726_v49 = vor.u32 %v4393_v46, %v3723_v48  ;;  %v3665_v50 = vld [vmem:[%s6470_s3 + $0x610] sm:$0xf]  ;;  %v4380_v51 = vld [vmem:[%s6470_s3 + $0x614] sm:$0xf0]  ;;  %v4434_v48 = vld [vmem:[%s6470_s3 + $0x7c4] sm:$0xf0] }
 0x370   :  { %v1406_v54 = vpop.f32.mrf.mxu3  ;;  %v1419_v55 = vpop.f32.mrf.mxu0 }
 0x371   :  { %v1405_v56 = vadd.f32 %v1404_v44, %v1392_v53  ;;  %1659 = vmatmul.bf16.vlgmr.msrb.gmra.mxu3 %v1437_v52  ;;  %1685 = vmatmul.bf16.vlgmr.msra.gmra.mxu1 %v1437_v52  ;;  %v3721_v44 = vld [vmem:[%s6470_s3 + $0x680] sm:$0xf]  ;;  %v4379_v52 = vld [vmem:[%s6470_s3 + $0x614] sm:$0xf]  ;;  %v3666_v53 = vor.u32 %v4380_v51, %v3665_v50  ;;  %v3667_v54 = vld [vmem:[%s6470_s3 + $0x618] sm:$0xf0] }
 0x372   :  { %v3722_v47 = vor.u32 %v4394_v45, %v3721_v44  ;;  %1940 = vmatpush.bf16.msrb.mxu1 %v3726_v49  ;;  %v3670_v55 = vor.u32 %v4379_v52, %v3667_v54  ;;  %v4433_v49 = vld [vmem:[%s6470_s3 + $0x7c4] sm:$0xf]  ;;  %v3916_v51 = vld [vmem:[%s6470_s3 + $0x7c8] sm:$0xf0]  ;;  %v3858_v52 = vld [vmem:[%s6470_s3 + $0x750] sm:$0xf] }
 0x373   :  { %v1434_v57 = vmax.f32 %v1405_v56, 0.0  ;;  %1900 = vmatpush.bf16.msra.mxu2 %v3666_v53  ;;  %v3657_v56 = vld [vmem:[%s6470_s3 + $0x600] sm:$0xf]  ;;  %v4420_v53 = vld [vmem:[%s6470_s3 + $0x754] sm:$0xf0]  ;;  %v3919_v54 = vor.u32 %v4433_v49, %v3916_v51 }
 0x374   :  { %1914 = vmatpush.bf16.msra.mxu3 %v3722_v47  ;;  %1926 = vmatpush.bf16.msrb.mxu0 %v3670_v55  ;;  %v3914_v47 = vld [vmem:[%s6470_s3 + $0x7c0] sm:$0xf]  ;;  %v3859_v55 = vor.u32 %v4420_v53, %v3858_v52  ;;  %v4099_v49 = vld [vmem:[%s6470_s3 + $0x8f0] sm:$0xf]  ;;  %v4471_v51 = vld [vmem:[%s6470_s3 + $0x8f4] sm:$0xf] }
 0x375   :  { %v1436_v58 = vpack.c.bf16 %v1434_v57, %v1434_v57  ;;  %v4378_v57 = vld [vmem:[%s6470_s3 + $0x604] sm:$0xf0]  ;;  %v3915_v50 = vor.u32 %v4434_v48, %v3914_v47  ;;  %v3820_v47 = vld [vmem:[%s6470_s3 + $0x708] sm:$0xf0]  ;;  %v4101_v53 = vld [vmem:[%s6470_s3 + $0x8f8] sm:$0xf0] }
 0x376   :  { %v1393_v59 = vpop.f32.mrf.mxu2  ;;  %2189 = vmatpush.bf16.msra.mxu1 %v3943_v5  ;;  %v3852_v5 = vld [vmem:[%s6470_s3 + $0x748] sm:$0xf0] }
 0x377   :  { %1646 = vmatmul.bf16.vlgmr.msrb.gmra.mxu2 %v1436_v58  ;;  %1672 = vmatmul.bf16.vlgmr.msra.gmra.mxu0 %v1436_v58  ;;  %v4377_v58 = vld [vmem:[%s6470_s3 + $0x604] sm:$0xf]  ;;  %v3658_v59 = vor.u32 %v4378_v57, %v3657_v56  ;;  %v4419_v56 = vld [vmem:[%s6470_s3 + $0x754] sm:$0xf]  ;;  %v3860_v57 = vld [vmem:[%s6470_s3 + $0x758] sm:$0xf0]  ;;  %v3855_v6 = vor.u32 %v4417_v4, %v3852_v5 }
 0x378   :  { %v3662_v61 = vor.u32 %v4377_v58, %v3659_v60  ;;  %2163 = vmatpush.bf16.msrb.mxu3 %v3939_v1  ;;  %v3906_v58 = vld [vmem:[%s6470_s3 + $0x7b0] sm:$0xf]  ;;  %v4432_v60 = vld [vmem:[%s6470_s3 + $0x7b4] sm:$0xf0]  ;;  %v3850_v1 = vld [vmem:[%s6470_s3 + $0x740] sm:$0xf] }
 0x379   :  { %1901 = vmatpush.bf16.msra.mxu2 %v3658_v59  ;;  %v3863_v59 = vor.u32 %v4419_v56, %v3860_v57  ;;  %v3907_v63 = vor.u32 %v4432_v60, %v3906_v58  ;;  %v3851_v3 = vor.u32 %v4418_v2, %v3850_v1  ;;  %v3654_v56 = vld [vmem:[%s6473_s4 + $0xc] sm:$0x3]  ;;  %v4104_v57 = vor.u32 %v4471_v51, %v4101_v53  ;;  %v4469_v58 = vld [vmem:[%s6470_s3 + $0x8e4] sm:$0xf]  ;;  %v4035_v60 = vld [vmem:[%s6470_s3 + $0x870] sm:$0xf] }
 0x37a   :  { %1927 = vmatpush.bf16.msrb.mxu0 %v3662_v61  ;;  %2190 = vmatpush.bf16.msra.mxu1 %v3935_v13  ;;  %v4431_v61 = vld [vmem:[%s6470_s3 + $0x7b4] sm:$0xf]  ;;  %v3842_v13 = vld [vmem:[%s6470_s3 + $0x730] sm:$0xf]  ;;  %v4468_v5 = vld [vmem:[%s6470_s3 + $0x8d4] sm:$0xf0] }
 0x37b   :  { %v3911_v0 = vor.u32 %v4431_v61, %v3908_v62  ;;  %v4456_v62 = vld [vmem:[%s6470_s3 + $0x874] sm:$0xf0]  ;;  %v4083_v4 = vld [vmem:[%s6470_s3 + $0x8d0] sm:$0xf]  ;;  %v4450_v53 = vld [vmem:[%s6470_s3 + $0x844] sm:$0xf0] }
 0x37c   :  { %2164 = vmatpush.bf16.msrb.mxu3 %v3931_v9  ;;  %v4429_v9 = vld [vmem:[%s6470_s3 + $0x7a4] sm:$0xf]  ;;  %v4036_v2 = vor.u32 %v4456_v62, %v4035_v60  ;;  %v4061_v62 = vld [vmem:[%s6470_s3 + $0x8a8] sm:$0xf0] }
 0x37d   :  { %2150 = vmatpush.bf16.msrb.mxu2 %v3875_v14  ;;  %v3903_v12 = vor.u32 %v4429_v9, %v3900_v11  ;;  %v4416_v14 = vld [vmem:[%s6470_s3 + $0x734] sm:$0xf0]  ;;  %v4454_v9 = vld [vmem:[%s6470_s3 + $0x864] sm:$0xf0] }
 0x37e   :  { %2176 = vmatpush.bf16.msra.mxu0 %v3879_v15  ;;  %2191 = vmatpush.bf16.msra.mxu1 %v3927_v29  ;;  %v4415_v15 = vld [vmem:[%s6470_s3 + $0x734] sm:$0xf]  ;;  %v3843_v16 = vor.u32 %v4416_v14, %v3842_v13  ;;  %v3836_v29 = vld [vmem:[%s6470_s3 + $0x728] sm:$0xf0]  ;;  %v4028_v11 = vor.u32 %v4454_v9, %v4027_v8  ;;  %v1731_v14 = vperm.slane %v3654_v56, 1 }
 0x37f   :  { %v3847_v18 = vor.u32 %v4415_v15, %v3844_v17  ;;  %v4029_v13 = vld [vmem:[%s6470_s3 + $0x868] sm:$0xf0]  ;;  %v4084_v15 = vor.u32 %v4468_v5, %v4083_v4  ;;  %v4075_v17 = vld [vmem:[%s6470_s3 + $0x8c0] sm:$0xf]  ;;  %v4005_v4 = vld [vmem:[%s6470_s3 + $0x838] sm:$0xf0] }
 0x380   :  { %2165 = vmatpush.bf16.msrb.mxu3 %v3923_v27  ;;  %v4413_v27 = vld [vmem:[%s6470_s3 + $0x724] sm:$0xf]  ;;  %v4459_v9 = vld [vmem:[%s6470_s3 + $0x894] sm:$0xf] }
 0x381   :  { %2151 = vmatpush.bf16.msrb.mxu2 %v3867_v24  ;;  %v3895_v24 = vor.u32 %v4427_v21, %v3892_v23  ;;  %v4452_v21 = vld [vmem:[%s6470_s3 + $0x854] sm:$0xf0]  ;;  %v4465_v23 = vld [vmem:[%s6470_s3 + $0x8c4] sm:$0xf] }
 0x382   :  { %2177 = vmatpush.bf16.msra.mxu0 %v3871_v28  ;;  %2192 = vmatpush.bf16.msra.mxu1 %v3919_v54  ;;  %v3835_v28 = vor.u32 %v4414_v26, %v3834_v25  ;;  %v4091_v54 = vld [vmem:[%s6470_s3 + $0x8e0] sm:$0xf]  ;;  %v4021_v25 = vld [vmem:[%s6470_s3 + $0x858] sm:$0xf0] }
 0x384   :  { %2166 = vmatpush.bf16.msrb.mxu3 %v3915_v50  ;;  %v4472_v50 = vld [vmem:[%s6470_s3 + $0x8f4] sm:$0xf0] }
 0x385   :  { %2152 = vmatpush.bf16.msrb.mxu2 %v3859_v55  ;;  %v4100_v52 = vor.u32 %v4472_v50, %v4099_v49  ;;  %v4470_v55 = vld [vmem:[%s6470_s3 + $0x8e4] sm:$0xf0]  ;;  %v4069_v50 = vld [vmem:[%s6470_s3 + $0x8b8] sm:$0xf0] }
 0x386   :  { %2178 = vmatpush.bf16.msra.mxu0 %v3863_v59  ;;  %2193 = vmatpush.bf16.msra.mxu1 %v3911_v0  ;;  %v4093_v59 = vld [vmem:[%s6470_s3 + $0x8e8] sm:$0xf0]  ;;  %v4092_v61 = vor.u32 %v4470_v55, %v4091_v54  ;;  %v4037_v0 = vld [vmem:[%s6470_s3 + $0x878] sm:$0xf0]  ;;  %v4449_v54 = vld [vmem:[%s6470_s3 + $0x844] sm:$0xf] }
 0x387   :  { %v4096_v1 = vor.u32 %v4469_v58, %v4093_v59  ;;  %v4462_v58 = vld [vmem:[%s6470_s3 + $0x8a4] sm:$0xf0] }
 0x388   :  { %2167 = vmatpush.bf16.msrb.mxu3 %v3907_v63  ;;  %v4455_v63 = vld [vmem:[%s6470_s3 + $0x874] sm:$0xf] }
 0x389   :  { %2153 = vmatpush.bf16.msrb.mxu2 %v3851_v3  ;;  %v4040_v3 = vor.u32 %v4455_v63, %v4037_v0  ;;  %v4003_v0 = vld [vmem:[%s6470_s3 + $0x830] sm:$0xf] }
 0x38a   :  { %2179 = vmatpush.bf16.msra.mxu0 %v3855_v6  ;;  %2194 = vmatpush.bf16.msra.mxu1 %v3903_v12  ;;  %v4467_v6 = vld [vmem:[%s6470_s3 + $0x8d4] sm:$0xf]  ;;  %v4453_v12 = vld [vmem:[%s6470_s3 + $0x864] sm:$0xf] }
 0x38c   :  { %2168 = vmatpush.bf16.msrb.mxu3 %v3899_v10 }
 0x38d   :  { %2154 = vmatpush.bf16.msrb.mxu2 %v3843_v16  ;;  %v4032_v16 = vor.u32 %v4453_v12, %v4029_v13  ;;  %v3995_v12 = vld [vmem:[%s6470_s3 + $0x820] sm:$0xf]  ;;  %v4446_v13 = vld [vmem:[%s6470_s3 + $0x824] sm:$0xf0] }
 0x38e   :  { %2180 = vmatpush.bf16.msra.mxu0 %v3847_v18  ;;  %2195 = vmatpush.bf16.msra.mxu1 %v3895_v24  ;;  %v4466_v18 = vld [vmem:[%s6470_s3 + $0x8c4] sm:$0xf0]  ;;  %v4077_v24 = vld [vmem:[%s6470_s3 + $0x8c8] sm:$0xf0] }
 0x391   :  { %2155 = vmatpush.bf16.msrb.mxu2 %v3835_v28  ;;  %v4076_v28 = vor.u32 %v4466_v18, %v4075_v17  ;;  %v4043_v18 = vld [vmem:[%s6470_s3 + $0x880] sm:$0xf] }
 0x3ee   :  { %v1686_v22 = vpop.f32.mrf.mxu1 }
 0x3f4   :  { %v1660_v31 = vpop.f32.mrf.mxu3  ;;  %v1673_v32 = vpop.f32.mrf.mxu0 }
 0x3f5   :  { %v1674_v33 = vadd.f32 %v1673_v32, %v1475_v30  ;;  %v3839_v30 = vor.u32 %v4413_v27, %v3836_v29  ;;  %v4426_v32 = vld [vmem:[%s6470_s3 + $0x784] sm:$0xf0] }
 0x3f6   :  { %v1688_v34 = vpop.f32.mrf.mxu1 }
 0x3f7   :  { %v1687_v35 = vadd.f32 %v1686_v22, %v1674_v33  ;;  %v3891_v22 = vor.u32 %v4428_v20, %v3890_v19  ;;  %v4425_v33 = vld [vmem:[%s6470_s3 + $0x784] sm:$0xf]  ;;  %2181 = vmatpush.bf16.msra.mxu0 %v3839_v30  ;;  %v4088_v19 = vor.u32 %v4467_v6, %v4085_v7  ;;  %v4019_v20 = vld [vmem:[%s6470_s3 + $0x850] sm:$0xf]  ;;  %v4460_v7 = vld [vmem:[%s6470_s3 + $0x894] sm:$0xf0] }
 0x3f8   :  { %v4020_v26 = vor.u32 %v4452_v21, %v4019_v20  ;;  %v4051_v6 = vld [vmem:[%s6470_s3 + $0x890] sm:$0xf]  ;;  %v4457_v20 = vld [vmem:[%s6470_s3 + $0x884] sm:$0xf] }
 0x3f9   :  { %4506 = vtanh.f32 %v1687_v35  ;;  %2169 = vmatpush.bf16.msrb.mxu3 %v3891_v22  ;;  %v3884_v35 = vld [vmem:[%s6470_s3 + $0x788] sm:$0xf0]  ;;  %v4451_v22 = vld [vmem:[%s6470_s3 + $0x854] sm:$0xf]  ;;  %v4052_v8 = vor.u32 %v4460_v7, %v4051_v6  ;;  %v4473_v6 = vld [vmem:[%s6474_s5] sm:$0xff] }
 0x3fa   :  { %v1647_v37 = vpop.f32.mrf.mxu2  ;;  %v4024_v27 = vor.u32 %v4451_v22, %v4021_v25  ;;  %v4045_v22 = vld [vmem:[%s6470_s3 + $0x888] sm:$0xf0]  ;;  %v4444_v25 = vld [vmem:[%s6470_s3 + $0x814] sm:$0xf0] }
 0x3fb   :  { %v1648_v38 = vadd.f32 %v1647_v37, %v1474_v36  ;;  %v3887_v36 = vor.u32 %v4425_v33, %v3884_v35  ;;  %v3826_v37 = vld [vmem:[%s6470_s3 + $0x710] sm:$0xf]  ;;  %v1730_v35 = vperm.slane %v3654_v56, 0  ;;  %v4013_v56 = vld [vmem:[%s6470_s3 + $0x848] sm:$0xf0] }
 0x3fc   :  { %v1662_v39 = vpop.f32.mrf.mxu3  ;;  %v1675_v40 = vpop.f32.mrf.mxu0  ;;  %v4016_v59 = vor.u32 %v4449_v54, %v4013_v56 }
 0x3fd   :  { %v1661_v41 = vadd.f32 %v1660_v31, %v1648_v38  ;;  %v3882_v31 = vld [vmem:[%s6470_s3 + $0x780] sm:$0xf]  ;;  %v4412_v38 = vld [vmem:[%s6470_s3 + $0x714] sm:$0xf0]  ;;  %v4411_v39 = vld [vmem:[%s6470_s3 + $0x714] sm:$0xf]  ;;  %2196 = vmatpush.bf16.msra.mxu1 %v3887_v36 }
 0x3fe   :  { %v3883_v34 = vor.u32 %v4426_v32, %v3882_v31  ;;  %v3827_v40 = vor.u32 %v4412_v38, %v3826_v37  ;;  %v4080_v31 = vor.u32 %v4465_v23, %v4077_v24  ;;  %v4048_v23 = vor.u32 %v4457_v20, %v4045_v22  ;;  %v3987_v24 = vld [vmem:[%s6470_s3 + $0x810] sm:$0xf] }
 0x3ff   :  { %v4507_v42 = vpop.eup %4506  ;;  %4508 = vtanh.f32 %v1661_v41  ;;  %v3828_v41 = vld [vmem:[%s6470_s3 + $0x718] sm:$0xf0] }
 0x400   :  { %v1693_v43 = vpack.c.bf16 %v4507_v42, %v4507_v42  ;;  %2170 = vmatpush.bf16.msrb.mxu3 %v3883_v34  ;;  %v3831_v42 = vor.u32 %v4411_v39, %v3828_v41  ;;  %2156 = vmatpush.bf16.msrb.mxu2 %v3827_v40 }
 0x402   :  { %v1649_v44 = vpop.f32.mrf.mxu2  ;;  %1915 = vmatmul.bf16.vlgmr.msra.gmra.mxu3 %v1693_v43  ;;  %1941 = vmatmul.bf16.vlgmr.msrb.gmra.mxu1 %v1693_v43  ;;  %v3818_v43 = vld [vmem:[%s6470_s3 + $0x700] sm:$0xf] }
 0x403   :  { %2182 = vmatpush.bf16.msra.mxu0 %v3831_v42  ;;  %v4410_v44 = vld [vmem:[%s6470_s3 + $0x704] sm:$0xf0]  ;;  %2445 = vmatpush.bf16.msrb.mxu1 %v4104_v57  ;;  %v4059_v57 = vld [vmem:[%s6470_s3 + $0x8a0] sm:$0xf] }
 0x404   :  { %2419 = vmatpush.bf16.msra.mxu3 %v4100_v52  ;;  %v4011_v52 = vld [vmem:[%s6470_s3 + $0x840] sm:$0xf]  ;;  %v4060_v60 = vor.u32 %v4462_v58, %v4059_v57 }
 0x405   :  { %v4509_v45 = vpop.eup %4508  ;;  %v4012_v55 = vor.u32 %v4450_v53, %v4011_v52 }
 0x406   :  { %v1692_v46 = vpack.c.bf16 %v4509_v45, %v4509_v45  ;;  %v4409_v45 = vld [vmem:[%s6470_s3 + $0x704] sm:$0xf] }
 0x407   :  { %v3823_v48 = vor.u32 %v4409_v45, %v3820_v47  ;;  %2446 = vmatpush.bf16.msrb.mxu1 %v4096_v1  ;;  %v4464_v47 = vld [vmem:[%s6470_s3 + $0x8b4] sm:$0xf0] }
 0x408   :  { %1902 = vmatmul.bf16.vlgmr.msra.gmra.mxu2 %v1692_v46  ;;  %1928 = vmatmul.bf16.vlgmr.msrb.gmra.mxu0 %v1692_v46  ;;  %v3819_v46 = vor.u32 %v4410_v44, %v3818_v43  ;;  %v4448_v1 = vld [vmem:[%s6470_s3 + $0x834] sm:$0xf0] }
 0x409   :  { %2183 = vmatpush.bf16.msra.mxu0 %v3823_v48  ;;  %2420 = vmatpush.bf16.msra.mxu3 %v4092_v61  ;;  %v4463_v48 = vld [vmem:[%s6470_s3 + $0x8b4] sm:$0xf]  ;;  %v4461_v61 = vld [vmem:[%s6470_s3 + $0x8a4] sm:$0xf] }
 0x40a   :  { %2157 = vmatpush.bf16.msrb.mxu2 %v3819_v46  ;;  %v4067_v46 = vld [vmem:[%s6470_s3 + $0x8b0] sm:$0xf]  ;;  %v4072_v51 = vor.u32 %v4463_v48, %v4069_v50  ;;  %v4064_v63 = vor.u32 %v4461_v61, %v4061_v62  ;;  %v4478_v61 = vld [vmem:[%s6474_s5 + $0x28] sm:$0xff]  ;;  %v4484_v62 = vld [vmem:[%s6474_s5 + $0x58] sm:$0xff] }
 0x40b   :  { %2447 = vmatpush.bf16.msrb.mxu1 %v4088_v19  ;;  %v4068_v49 = vor.u32 %v4464_v47, %v4067_v46  ;;  %v4458_v19 = vld [vmem:[%s6470_s3 + $0x884] sm:$0xf0] }
 0x40c   :  { %v4044_v21 = vor.u32 %v4458_v19, %v4043_v18 }
 0x40d   :  { %2432 = vmatpush.bf16.msrb.mxu0 %v4040_v3  ;;  %2421 = vmatpush.bf16.msra.mxu3 %v4084_v15  ;;  %v4004_v3 = vor.u32 %v4448_v1, %v4003_v0  ;;  %v3996_v15 = vor.u32 %v4446_v13, %v3995_v12  ;;  %v4483_v0 = vld [vmem:[%s6474_s5 + $0x50] sm:$0xff]  ;;  %v4476_v1 = vld [vmem:[%s6474_s5 + $0x18] sm:$0xff] }
 0x40e   :  { %2406 = vmatpush.bf16.msra.mxu2 %v4036_v2  ;;  %v4447_v2 = vld [vmem:[%s6470_s3 + $0x834] sm:$0xf] }
 0x40f   :  { %2448 = vmatpush.bf16.msrb.mxu1 %v4080_v31  ;;  %v4008_v5 = vor.u32 %v4447_v2, %v4005_v4  ;;  %v4442_v31 = vld [vmem:[%s6470_s3 + $0x804] sm:$0xf0]  ;;  %v4481_v4 = vld [vmem:[%s6474_s5 + $0x40] sm:$0xff] }
 0x410   :  { %v4482_v2 = vld [vmem:[%s6474_s5 + $0x48] sm:$0xff] }
 0x411   :  { %2433 = vmatpush.bf16.msrb.mxu0 %v4032_v16  ;;  %2422 = vmatpush.bf16.msra.mxu3 %v4076_v28  ;;  %v3997_v16 = vld [vmem:[%s6470_s3 + $0x828] sm:$0xf0]  ;;  %v3989_v28 = vld [vmem:[%s6470_s3 + $0x818] sm:$0xf0] }
 0x412   :  { %2407 = vmatpush.bf16.msra.mxu2 %v4028_v11 }
 0x413   :  { %2449 = vmatpush.bf16.msrb.mxu1 %v4072_v51 }
 0x415   :  { %2434 = vmatpush.bf16.msrb.mxu0 %v4024_v27  ;;  %2423 = vmatpush.bf16.msra.mxu3 %v4068_v49  ;;  %v4443_v27 = vld [vmem:[%s6470_s3 + $0x814] sm:$0xf] }
 0x416   :  { %2408 = vmatpush.bf16.msra.mxu2 %v4020_v26  ;;  %v3988_v26 = vor.u32 %v4444_v25, %v3987_v24 }
 0x417   :  { %2450 = vmatpush.bf16.msrb.mxu1 %v4064_v63  ;;  %v4477_v63 = vld [vmem:[%s6474_s5 + $0x20] sm:$0xff] }
 0x419   :  { %2435 = vmatpush.bf16.msrb.mxu0 %v4016_v59  ;;  %2424 = vmatpush.bf16.msra.mxu3 %v4060_v60  ;;  %v4485_v60 = vld [vmem:[%s6474_s5 + $0x60] sm:$0xff] }
 0x41a   :  { %2409 = vmatpush.bf16.msra.mxu2 %v4012_v55 }
 0x41d   :  { %2436 = vmatpush.bf16.msrb.mxu0 %v4008_v5  ;;  %2425 = vmatpush.bf16.msra.mxu3 %v4052_v8  ;;  %v4474_v5 = vld [vmem:[%s6474_s5 + $0x8] sm:$0xff]  ;;  %v3976_v8 = vld [vmem:[%s6473_s4 + $0x10] sm:$0x3] }
 0x41e   :  { %2410 = vmatpush.bf16.msra.mxu2 %v4004_v3  ;;  %v4475_v3 = vld [vmem:[%s6474_s5 + $0x10] sm:$0xff] }
 0x421   :  { %2426 = vmatpush.bf16.msra.mxu3 %v4044_v21 }
 0x422   :  { %2411 = vmatpush.bf16.msra.mxu2 %v3996_v15  ;;  %v2242_v15 = vperm.slane %v3976_v8, 0 }
 0x426   :  { %2412 = vmatpush.bf16.msra.mxu2 %v3988_v26 }
 0x47f   :  { %v1942_v10 = vpop.f32.mrf.mxu1 }
 0x485   :  { %v1916_v29 = vpop.f32.mrf.mxu3  ;;  %v1929_v30 = vpop.f32.mrf.mxu0 }
 0x486   :  { %v1930_v32 = vadd.f32 %v1929_v30, %v1731_v14  ;;  %v4445_v14 = vld [vmem:[%s6470_s3 + $0x824] sm:$0xf]  ;;  %v3979_v30 = vld [vmem:[%s6470_s3 + $0x800] sm:$0xf] }
 0x487   :  { %v1944_v33 = vpop.f32.mrf.mxu1  ;;  %v4000_v17 = vor.u32 %v4445_v14, %v3997_v16 }
 0x488   :  { %v1943_v34 = vadd.f32 %v1942_v10, %v1930_v32  ;;  %v4053_v10 = vld [vmem:[%s6470_s3 + $0x898] sm:$0xf0]  ;;  %v4441_v32 = vld [vmem:[%s6470_s3 + $0x804] sm:$0xf]  ;;  %v3980_v33 = vor.u32 %v4442_v31, %v3979_v30 }
 0x489   :  { %v4056_v11 = vor.u32 %v4459_v9, %v4053_v10  ;;  %2437 = vmatpush.bf16.msrb.mxu0 %v4000_v17  ;;  %v2243_v9 = vperm.slane %v3976_v8, 1 }
 0x48a   :  { %4510 = vtanh.f32 %v1943_v34  ;;  %v3981_v34 = vld [vmem:[%s6470_s3 + $0x808] sm:$0xf0]  ;;  %2413 = vmatpush.bf16.msra.mxu2 %v3980_v33 }
 0x48b   :  { %v1903_v36 = vpop.f32.mrf.mxu2  ;;  %2451 = vmatpush.bf16.msrb.mxu1 %v4056_v11 }
 0x48c   :  { %v1904_v37 = vadd.f32 %v1903_v36, %v1730_v35  ;;  %v3984_v35 = vor.u32 %v4441_v32, %v3981_v34  ;;  %v4488_v36 = vld [vmem:[%s6474_s5 + $0x78] sm:$0xff] }
 0x48d   :  { %v1918_v38 = vpop.f32.mrf.mxu3  ;;  %v1931_v39 = vpop.f32.mrf.mxu0 }
 0x48e   :  { %v1917_v40 = vadd.f32 %v1916_v29, %v1904_v37  ;;  %v3992_v29 = vor.u32 %v4443_v27, %v3989_v28  ;;  %v4480_v37 = vld [vmem:[%s6474_s5 + $0x38] sm:$0xff]  ;;  %v4487_v38 = vld [vmem:[%s6474_s5 + $0x70] sm:$0xff]  ;;  %v4489_v27 = vld [vmem:[%s6475_s6] ss:$0 sm:$0xff] }
 0x48f   :  { %2452 = vmatpush.bf16.msrb.mxu1 %v4048_v23  ;;  %v4479_v39 = vld [vmem:[%s6474_s5 + $0x30] sm:$0xff] }
 0x490   :  { %v4511_v41 = vpop.eup %4510  ;;  %4512 = vtanh.f32 %v1917_v40  ;;  %2438 = vmatpush.bf16.msrb.mxu0 %v3992_v29  ;;  %v4486_v40 = vld [vmem:[%s6474_s5 + $0x68] sm:$0xff] }
 0x491   :  { %v1949_v42 = vpack.c.bf16 %v4511_v41, %v4511_v41 }
 0x493   :  { %v1905_v43 = vpop.f32.mrf.mxu2  ;;  %2171 = vmatmul.bf16.vlgmr.msrb.gmra.mxu3 %v1949_v42  ;;  %2197 = vmatmul.bf16.vlgmr.msra.gmra.mxu1 %v1949_v42  ;;  %v3815_v42 = vld [vmem:[%s6473_s4 + $0xe] sm:$0x3] }
 0x494   :  { %2439 = vmatpush.bf16.msrb.mxu0 %v3984_v35  ;;  %2607 = vmatpush.bf16.msrb.mxu3 %v4488_v36  ;;  %v1987_v43 = vperm.slane %v3815_v42, 1  ;;  %v1986_v49 = vperm.slane %v3815_v42, 0 }
 0x496   :  { %v4513_v44 = vpop.eup %4512 }
 0x497   :  { %v1948_v45 = vpack.c.bf16 %v4513_v44, %v4513_v44 }
 0x498   :  { %2608 = vmatpush.bf16.msrb.mxu3 %v4487_v38 }
 0x499   :  { %2158 = vmatmul.bf16.vlgmr.msrb.gmra.mxu2 %v1948_v45  ;;  %2184 = vmatmul.bf16.vlgmr.msra.gmra.mxu0 %v1948_v45 }
 0x49a   :  { %2594 = vmatpush.bf16.msrb.mxu2 %v4480_v37 }
 0x49c   :  { %2609 = vmatpush.bf16.msrb.mxu3 %v4486_v40 }
 0x49e   :  { %2595 = vmatpush.bf16.msrb.mxu2 %v4479_v39 }
 0x4a0   :  { %2610 = vmatpush.bf16.msrb.mxu3 %v4485_v60 }
 0x4a2   :  { %2596 = vmatpush.bf16.msrb.mxu2 %v4478_v61 }
 0x4a4   :  { %2611 = vmatpush.bf16.msrb.mxu3 %v4484_v62 }
 0x4a6   :  { %2597 = vmatpush.bf16.msrb.mxu2 %v4477_v63 }
 0x4a8   :  { %2612 = vmatpush.bf16.msrb.mxu3 %v4483_v0 }
 0x4aa   :  { %2598 = vmatpush.bf16.msrb.mxu2 %v4476_v1 }
 0x4ac   :  { %2613 = vmatpush.bf16.msrb.mxu3 %v4482_v2 }
 0x4ae   :  { %2599 = vmatpush.bf16.msrb.mxu2 %v4475_v3 }
 0x4b0   :  { %2614 = vmatpush.bf16.msrb.mxu3 %v4481_v4 }
 0x4b2   :  { %2600 = vmatpush.bf16.msrb.mxu2 %v4474_v5 }
 0x4b6   :  { %2601 = vmatpush.bf16.msrb.mxu2 %v4473_v6 }
 0x510   :  { %v2198_v41 = vpop.f32.mrf.mxu1 }
 0x516   :  { %v2172_v44 = vpop.f32.mrf.mxu3  ;;  %v2185_v45 = vpop.f32.mrf.mxu0 }
 0x517   :  { %v2186_v46 = vadd.f32 %v2185_v45, %v1987_v43 }
 0x518   :  { %v2200_v47 = vpop.f32.mrf.mxu1 }
 0x519   :  { %v2199_v48 = vadd.f32 %v2198_v41, %v2186_v46 }
 0x51b   :  { %v2203_v50 = vmax.f32 %v2199_v48, 0.0 }
 0x51c   :  { %v2159_v51 = vpop.f32.mrf.mxu2 }
 0x51d   :  { %v2205_v52 = vpack.c.bf16 %v2203_v50, %v2203_v50  ;;  %v2160_v53 = vadd.f32 %v2159_v51, %v1986_v49 }
 0x51e   :  { %v2174_v54 = vpop.f32.mrf.mxu3  ;;  %v2187_v55 = vpop.f32.mrf.mxu0 }
 0x51f   :  { %v2173_v56 = vadd.f32 %v2172_v44, %v2160_v53  ;;  %2427 = vmatmul.bf16.vlgmr.msra.gmra.mxu3 %v2205_v52  ;;  %2453 = vmatmul.bf16.vlgmr.msrb.gmra.mxu1 %v2205_v52 }
 0x521   :  { %v2202_v57 = vmax.f32 %v2173_v56, 0.0 }
 0x523   :  { %v2204_v58 = vpack.c.bf16 %v2202_v57, %v2202_v57 }
 0x524   :  { %v2161_v59 = vpop.f32.mrf.mxu2 }
 0x525   :  { %2414 = vmatmul.bf16.vlgmr.msra.gmra.mxu2 %v2204_v58  ;;  %2440 = vmatmul.bf16.vlgmr.msrb.gmra.mxu0 %v2204_v58 }
 0x59c   :  { %v2454_v7 = vpop.f32.mrf.mxu1 }
 0x5a2   :  { %v2428_v10 = vpop.f32.mrf.mxu3  ;;  %v2441_v11 = vpop.f32.mrf.mxu0 }
 0x5a3   :  { %v2442_v12 = vadd.f32 %v2441_v11, %v2243_v9 }
 0x5a4   :  { %v2456_v13 = vpop.f32.mrf.mxu1 }
 0x5a5   :  { %v2455_v14 = vadd.f32 %v2454_v7, %v2442_v12 }
 0x5a7   :  { %4514 = vtanh.f32 %v2455_v14 }
 0x5a8   :  { %v2415_v16 = vpop.f32.mrf.mxu2 }
 0x5a9   :  { %v2416_v17 = vadd.f32 %v2415_v16, %v2242_v15 }
 0x5aa   :  { %v2430_v18 = vpop.f32.mrf.mxu3  ;;  %v2443_v19 = vpop.f32.mrf.mxu0 }
 0x5ab   :  { %v2429_v20 = vadd.f32 %v2428_v10, %v2416_v17 }
 0x5ad   :  { %v4515_v21 = vpop.eup %4514  ;;  %4516 = vtanh.f32 %v2429_v20 }
 0x5ae   :  { %v2461_v22 = vpack.c.bf16 %v4515_v21, %v4515_v21 }
 0x5b0   :  { %v2417_v23 = vpop.f32.mrf.mxu2  ;;  %2615 = vmatmul.bf16.vlgmr.msrb.gmra.mxu3 %v2461_v22 }
 0x5b3   :  { %v4517_v24 = vpop.eup %4516 }
 0x5b4   :  { %v2460_v25 = vpack.c.bf16 %v4517_v24, %v4517_v24 }
 0x5b6   :  { %2602 = vmatmul.bf16.vlgmr.msrb.gmra.mxu2 %v2460_v25 }
 0x633   :  { %v2616_v26 = vpop.f32.mrf.mxu3 }
 0x639   :  { %v2603_v28 = vpop.f32.mrf.mxu2 }
 0x63a   :  { %v2604_v29 = vadd.f32 %v4489_v27, %v2603_v28 }
 0x63b   :  { %v2618_v30 = vpop.f32.mrf.mxu3 }
 0x63c   :  { %v2617_v31 = vadd.f32 %v2616_v26, %v2604_v29 }
 0x63e   :  { %2620 = vst [vmem:[%s6476_s7] sm:$0xff] %v2617_v31 }
 0x641   :  { %v2605_v32 = vpop.f32.mrf.mxu2 }

</bundles_post_ra>
